<compile_context>
chip_gen: v7x
topology: tpu7x:2x2x1
jax: 0.10.0
libtpu: 0.0.40
codegen_flags: <defaults>
</compile_context>

<pallas_src>
import jax
import jax.numpy as jnp
from jax import lax
from jax.experimental import pallas as pl
from jax.experimental.pallas import tpu as pltpu


def _recip(x):
    """EUP approximate reciprocal + one Newton refinement (~f32 accuracy)."""
    r = pl.reciprocal(x, approx=True)
    return r * (2.0 - x * r)


def _bp_hdfnn_kernel(x_ref, lhs_ref, const_ref, w5b_ref, out_ref):
    # x_ref     : (A, Br, F, TB)   input tile, batch on lanes (contiguous DMA)
    # lhs_ref   : (A, Br, 2R, 2F)  stacked MXU operand:
    #               rows 0..R-1 : [-1/(2s^2) | 2*mu/(2s^2)]   -> log firing strength
    #               rows R..2R-1: [    0     | w5[a,b]*w3_w ] -> scaled consequent
    # const_ref : (A, Br, 2R, 1)   matching constant column (mu^2 term / scaled bias)
    # w5b_ref   : (A,)             defuzzification bias (SMEM scalars)
    # out_ref   : (A, TB)          softmax over agents (lane-dense store)
    n_agents, n_branch, _, _ = x_ref.shape
    n_rules = lhs_ref.shape[2] // 2

    # A*Br = 6 here, so the full unroll is fine and gives the scheduler visibility.
    # TODO(synk): switch the a/b loops to lax.fori_loop over a stacked (A*Br, ...)
    # param layout if A*Br*R ever grows enough to pressure the 64 vregs.
    logits = []
    for a in range(n_agents):
        acc = None
        for b in range(n_branch):
            x = x_ref[a, b]                                    # (F, TB)
            rhs = jnp.concatenate([x * x, x], axis=0)          # (2F, TB)
            # One MXU matmul per branch produces the Gaussian exponents and the
            # (w5-scaled) TSK consequents for all rules at once.
            sc = jnp.dot(lhs_ref[a, b], rhs,
                         preferred_element_type=jnp.float32,
                         precision=lax.Precision.HIGHEST)      # (2R, TB)
            sc = sc + const_ref[a, b]                          # + constant column
            s = sc[:n_rules]                                   # log firing strengths
            conq = sc[n_rules:]                                # w5[a,b] * (w.x + b)

            # softmax-over-rules on the packed (R, TB) tile == normalized firing.
            m = jnp.max(s, axis=0, keepdims=True)              # (1, TB)
            e = jnp.exp(s - m)                                 # (R, TB)
            den = jnp.sum(e, axis=0, keepdims=True)
            num = jnp.sum(e * conq, axis=0, keepdims=True)
            term = num * _recip(den)                           # == w5[a,b] * tsk
            acc = term if acc is None else acc + term
        logits.append(acc + w5b_ref[a])                        # + defuzz bias

    # softmax over agents on one packed (A, TB) tile, stored lane-dense.
    logit = jnp.concatenate(logits, axis=0)                    # (A, TB)
    m = jnp.max(logit, axis=0, keepdims=True)
    e = jnp.exp(logit - m)
    den = jnp.sum(e, axis=0, keepdims=True)
    out_ref[...] = e * _recip(den)


def bp_hdfnn_forward(data, para_mu, para_sigma, para_w3, para_w5, *,
                     batch_tile=None):
    """Pallas forward.

    data: (A, Br, B, F)   para_mu/sigma: (A, Br, R, F)
    para_w3: (A, Br, R, F+1)   para_w5: (A, Br+1)
    Returns (A, B) float32 (softmax over agents per sample).
    """
    A, Br, B, F = data.shape
    R = para_mu.shape[2]
    f32 = jnp.float32

    data = data.astype(f32)
    mu = para_mu.astype(f32)
    sigma = para_sigma.astype(f32)
    w3 = para_w3.astype(f32)
    w5 = para_w5.astype(f32)

    # ---- one-time, grid-constant parameter folding (wrapper-side) ----
    i2s = 1.0 / (2.0 * sigma * sigma)                                  # 1/(2 s^2)
    # -(x-mu)^2/(2s^2) == (-i2s).x^2 + (2 mu i2s).x + (-sum_f mu^2 i2s)
    coef_s = jnp.concatenate([-i2s, 2.0 * mu * i2s], axis=-1)          # (A,Br,R,2F)
    const_s = -jnp.sum(mu * mu * i2s, axis=-1, keepdims=True)          # (A,Br,R,1)
    # consequent, pre-scaled by the defuzzification weight w5[a, b]
    w5_br = w5[:, :Br][:, :, None, None]                               # (A,Br,1,1)
    coef_c = jnp.concatenate(
        [jnp.zeros_like(i2s), w5_br * w3[..., :F]], axis=-1)           # (A,Br,R,2F)
    const_c = w5_br * w3[..., F:]                                      # (A,Br,R,1)
    lhs = jnp.concatenate([coef_s, coef_c], axis=2)                    # (A,Br,2R,2F)
    const = jnp.concatenate([const_s, const_c], axis=2)                # (A,Br,2R,1)
    w5_bias = w5[:, Br]                                                # (A,)

    # ---- batch tiling: batch on lanes, >=2 grid steps when B allows ----
    if batch_tile is None:
        tb = min(1024, max(128, ((pl.cdiv(B, 2) + 127) // 128) * 128))
    else:
        tb = batch_tile
    num_tiles = pl.cdiv(B, tb)
    b_pad = num_tiles * tb

    dataT = jnp.transpose(data, (0, 1, 3, 2))                          # (A,Br,F,B)
    if b_pad != B:
        dataT = jnp.pad(dataT, ((0, 0), (0, 0), (0, 0), (0, b_pad - B)))
    # tile-major layout so each grid step's block is one contiguous HBM copy.
    data_tiles = dataT.reshape(A, Br, F, num_tiles, tb).transpose(3, 0, 1, 2, 4)

    out = pl.pallas_call(
        _bp_hdfnn_kernel,
        out_shape=jax.ShapeDtypeStruct((A, b_pad), f32),
        grid_spec=pltpu.PrefetchScalarGridSpec(
            num_scalar_prefetch=0,
            grid=(num_tiles,),
            in_specs=[
                # data tile: leading tile axis is squeezed, rest full.
                pl.BlockSpec((None, A, Br, F, tb), lambda i: (i, 0, 0, 0, 0)),
                # grid-constant params stay VMEM-resident across the grid.
                pl.BlockSpec((A, Br, 2 * R, 2 * F), lambda i: (0, 0, 0, 0)),
                pl.BlockSpec((A, Br, 2 * R, 1), lambda i: (0, 0, 0, 0)),
                pl.BlockSpec(memory_space=pltpu.MemorySpace.SMEM),     # w5 bias
            ],
            out_specs=pl.BlockSpec((A, tb), lambda i: (0, i)),
        ),
        compiler_params=pltpu.CompilerParams(
            dimension_semantics=("parallel",)),
    )(data_tiles, lhs, const, w5_bias)

    return out[:, :B]


def bp_hdfnn_reference(data, para_mu, para_sigma, para_w3, para_w5):
    """Pure-JAX mirror of the PyTorch per-sample loop (vmapped over batch)."""
    F = data.shape[-1]

    def one(x):                                  # x: (A, Br, F) == data[:, :, i, :]
        xr = x[:, :, None, :]                    # (A, Br, 1, F)
        memb = jnp.exp(-((xr - para_mu) ** 2) / (2.0 * para_sigma ** 2))
        rule = jnp.prod(memb, axis=3)            # (A, Br, R)
        inv_frn = 1.0 / jnp.sum(rule, axis=2, keepdims=True)
        norm = rule * inv_frn
        conq = para_w3[..., -1] + jnp.sum(para_w3[..., :F] * xr, axis=3)
        tsk = jnp.sum(norm * conq, axis=2)       # (A, Br)
        final = para_w5[:, -1] + jnp.sum(para_w5[:, :-1] * tsk, axis=1)
        return jax.nn.softmax(final, axis=0)     # softmax over agents

    return jax.vmap(one, in_axes=2, out_axes=1)(data)        # (A, B)


if __name__ == "__main__":
    n_agents, n_brunch, n_rules, n_fea, n_batch = 2, 3, 4, 16, 200

    key = jax.random.PRNGKey(0)
    k_mu, k_sig, k_w3, k_w5, k_x = jax.random.split(key, 5)

    para_mu = jax.random.uniform(
        k_mu, (n_agents, n_brunch, n_rules, n_fea), dtype=jnp.float32)
    # Keep sigma away from 0 so the naive prod-of-exp *reference* stays finite
    # in f32 (the kernel works in log domain and is underflow-safe regardless).
    para_sigma = 0.5 + jax.random.uniform(
        k_sig, (n_agents, n_brunch, n_rules, n_fea), dtype=jnp.float32)
    para_w3 = jax.random.uniform(
        k_w3, (n_agents, n_brunch, n_rules, n_fea + 1), dtype=jnp.float32)
    para_w5 = jax.random.uniform(
        k_w5, (n_agents, n_brunch + 1), dtype=jnp.float32)
    data = jax.random.uniform(
        k_x, (n_agents, n_brunch, n_batch, n_fea), dtype=jnp.float32)

    result = bp_hdfnn_forward(data, para_mu, para_sigma, para_w3, para_w5)
    result = jax.block_until_ready(result)

    ref = bp_hdfnn_reference(data, para_mu, para_sigma, para_w3, para_w5)
    assert result.shape == (n_agents, n_batch)
    # Outputs are softmax probabilities in (0, 1); 1e-3 headroom covers f32
    # reassociation from expanding (x-mu)^2 on the MXU path plus the
    # Newton-refined approximate reciprocals.
    assert jnp.allclose(result, ref, rtol=1e-3, atol=1e-3), float(
        jnp.max(jnp.abs(result - ref)))

    print("KERNEL_OK")
</pallas_src>

<mosaic_0001>
module attributes {stable_mosaic.version = 11 : i64} {
  func.func @_bp_hdfnn_kernel(%arg0: i32, %arg1: memref<1x2x3x16x128xf32, #tpu.memory_space<vmem>>, %arg2: memref<2x3x8x32xf32, #tpu.memory_space<vmem>>, %arg3: memref<2x3x8x1xf32, #tpu.memory_space<vmem>>, %arg4: memref<2xf32, #tpu.memory_space<smem>>, %arg5: memref<2x128xf32, #tpu.memory_space<vmem>>) attributes {dimension_semantics = [#tpu.dimension_semantics<parallel>], iteration_bounds = array<i64: 2>, scalar_prefetch = 0 : i64, scratch_operands = 0 : i64, tpu.core_type = #tpu.core_type<tc>, window_params = [{transform_indices = @transform_0, window_bounds = array<i64: 1, 2, 3, 16, 128>}, {pipeline_mode = #tpu.pipeline_mode<synchronous>, transform_indices = @transform_1, window_bounds = array<i64: 2, 3, 8, 32>}, {pipeline_mode = #tpu.pipeline_mode<synchronous>, transform_indices = @transform_2, window_bounds = array<i64: 2, 3, 8, 1>}, {transform_indices = @transform_3, window_bounds = array<i64: 2>}, {transform_indices = @transform_4, window_bounds = array<i64: 2, 128>}]} {
    %c0 = arith.constant 0 : index
    %c0_0 = arith.constant 0 : index
    %c0_1 = arith.constant 0 : index
    %c0_2 = arith.constant 0 : index
    %c0_3 = arith.constant 0 : index
    %0 = vector.load %arg1[%c0, %c0_0, %c0_1, %c0_2, %c0_3] : memref<1x2x3x16x128xf32, #tpu.memory_space<vmem>>, vector<1x1x1x16x128xf32>
    %1 = vector.shape_cast %0 : vector<1x1x1x16x128xf32> to vector<16x128xf32>
    %2 = arith.mulf %1, %1 : vector<16x128xf32>
    %3 = tpu.concatenate %2, %1 in 0 : vector<16x128xf32>, vector<16x128xf32> -> vector<32x128xf32>
    %c0_4 = arith.constant 0 : index
    %c0_5 = arith.constant 0 : index
    %c0_6 = arith.constant 0 : index
    %c0_7 = arith.constant 0 : index
    %4 = vector.load %arg2[%c0_4, %c0_5, %c0_6, %c0_7] : memref<2x3x8x32xf32, #tpu.memory_space<vmem>>, vector<1x1x8x32xf32>
    %5 = vector.shape_cast %4 : vector<1x1x8x32xf32> to vector<8x32xf32>
    %cst = arith.constant dense<0.000000e+00> : vector<8x128xf32>
    %6 = tpu.matmul %5, %3, %cst {dimension_numbers = #tpu.dot_dimension_numbers<[1], [0], [0], [1], [0, 0, 1, 1], [], []>, precision = #tpu.contract_precision<fp32>} : vector<8x32xf32>, vector<32x128xf32>, vector<8x128xf32> -> vector<8x128xf32>
    %c0_8 = arith.constant 0 : index
    %c0_9 = arith.constant 0 : index
    %c0_10 = arith.constant 0 : index
    %c0_11 = arith.constant 0 : index
    %7 = vector.load %arg3[%c0_8, %c0_9, %c0_10, %c0_11] : memref<2x3x8x1xf32, #tpu.memory_space<vmem>>, vector<1x1x8x1xf32>
    %8 = vector.shape_cast %7 : vector<1x1x8x1xf32> to vector<8x1xf32>
    %9 = vector.broadcast %8 : vector<8x1xf32> to vector<8x128xf32>
    %10 = arith.addf %6, %9 : vector<8x128xf32>
    %11 = vector.extract_strided_slice %10 {offsets = [0, 0], sizes = [4, 128], strides = [1, 1]} : vector<8x128xf32> to vector<4x128xf32>
    %12 = vector.extract_strided_slice %10 {offsets = [4, 0], sizes = [4, 128], strides = [1, 1]} : vector<8x128xf32> to vector<4x128xf32>
    %cst_12 = arith.constant dense<0xFF800000> : vector<128xf32>
    %13 = vector.multi_reduction <maximumf>, %11, %cst_12 [0] : vector<4x128xf32> to vector<128xf32>
    %14 = vector.shape_cast %13 : vector<128xf32> to vector<1x128xf32>
    %15 = vector.broadcast %14 : vector<1x128xf32> to vector<4x128xf32>
    %16 = arith.subf %11, %15 : vector<4x128xf32>
    %17 = math.exp %16 : vector<4x128xf32>
    %cst_13 = arith.constant dense<0.000000e+00> : vector<128xf32>
    %18 = vector.multi_reduction <add>, %17, %cst_13 [0] : vector<4x128xf32> to vector<128xf32>
    %19 = vector.shape_cast %18 : vector<128xf32> to vector<1x128xf32>
    %20 = arith.mulf %17, %12 : vector<4x128xf32>
    %cst_14 = arith.constant dense<0.000000e+00> : vector<128xf32>
    %21 = vector.multi_reduction <add>, %20, %cst_14 [0] : vector<4x128xf32> to vector<128xf32>
    %22 = vector.shape_cast %21 : vector<128xf32> to vector<1x128xf32>
    %23 = tpu.reciprocal %19 {approx = true} : vector<1x128xf32> -> vector<1x128xf32>
    %24 = arith.mulf %19, %23 : vector<1x128xf32>
    %cst_15 = arith.constant 2.000000e+00 : f32
    %25 = vector.broadcast %cst_15 : f32 to vector<1x128xf32>
    %26 = arith.subf %25, %24 : vector<1x128xf32>
    %27 = arith.mulf %23, %26 : vector<1x128xf32>
    %28 = arith.mulf %22, %27 : vector<1x128xf32>
    %c0_16 = arith.constant 0 : index
    %c0_17 = arith.constant 0 : index
    %c1 = arith.constant 1 : index
    %c0_18 = arith.constant 0 : index
    %c0_19 = arith.constant 0 : index
    %29 = vector.load %arg1[%c0_16, %c0_17, %c1, %c0_18, %c0_19] : memref<1x2x3x16x128xf32, #tpu.memory_space<vmem>>, vector<1x1x1x16x128xf32>
    %30 = vector.shape_cast %29 : vector<1x1x1x16x128xf32> to vector<16x128xf32>
    %31 = arith.mulf %30, %30 : vector<16x128xf32>
    %32 = tpu.concatenate %31, %30 in 0 : vector<16x128xf32>, vector<16x128xf32> -> vector<32x128xf32>
    %c0_20 = arith.constant 0 : index
    %c1_21 = arith.constant 1 : index
    %c0_22 = arith.constant 0 : index
    %c0_23 = arith.constant 0 : index
    %33 = vector.load %arg2[%c0_20, %c1_21, %c0_22, %c0_23] : memref<2x3x8x32xf32, #tpu.memory_space<vmem>>, vector<1x1x8x32xf32>
    %34 = vector.shape_cast %33 : vector<1x1x8x32xf32> to vector<8x32xf32>
    %cst_24 = arith.constant dense<0.000000e+00> : vector<8x128xf32>
    %35 = tpu.matmul %34, %32, %cst_24 {dimension_numbers = #tpu.dot_dimension_numbers<[1], [0], [0], [1], [0, 0, 1, 1], [], []>, precision = #tpu.contract_precision<fp32>} : vector<8x32xf32>, vector<32x128xf32>, vector<8x128xf32> -> vector<8x128xf32>
    %c0_25 = arith.constant 0 : index
    %c1_26 = arith.constant 1 : index
    %c0_27 = arith.constant 0 : index
    %c0_28 = arith.constant 0 : index
    %36 = vector.load %arg3[%c0_25, %c1_26, %c0_27, %c0_28] : memref<2x3x8x1xf32, #tpu.memory_space<vmem>>, vector<1x1x8x1xf32>
    %37 = vector.shape_cast %36 : vector<1x1x8x1xf32> to vector<8x1xf32>
    %38 = vector.broadcast %37 : vector<8x1xf32> to vector<8x128xf32>
    %39 = arith.addf %35, %38 : vector<8x128xf32>
    %40 = vector.extract_strided_slice %39 {offsets = [0, 0], sizes = [4, 128], strides = [1, 1]} : vector<8x128xf32> to vector<4x128xf32>
    %41 = vector.extract_strided_slice %39 {offsets = [4, 0], sizes = [4, 128], strides = [1, 1]} : vector<8x128xf32> to vector<4x128xf32>
    %cst_29 = arith.constant dense<0xFF800000> : vector<128xf32>
    %42 = vector.multi_reduction <maximumf>, %40, %cst_29 [0] : vector<4x128xf32> to vector<128xf32>
    %43 = vector.shape_cast %42 : vector<128xf32> to vector<1x128xf32>
    %44 = vector.broadcast %43 : vector<1x128xf32> to vector<4x128xf32>
    %45 = arith.subf %40, %44 : vector<4x128xf32>
    %46 = math.exp %45 : vector<4x128xf32>
    %cst_30 = arith.constant dense<0.000000e+00> : vector<128xf32>
    %47 = vector.multi_reduction <add>, %46, %cst_30 [0] : vector<4x128xf32> to vector<128xf32>
    %48 = vector.shape_cast %47 : vector<128xf32> to vector<1x128xf32>
    %49 = arith.mulf %46, %41 : vector<4x128xf32>
    %cst_31 = arith.constant dense<0.000000e+00> : vector<128xf32>
    %50 = vector.multi_reduction <add>, %49, %cst_31 [0] : vector<4x128xf32> to vector<128xf32>
    %51 = vector.shape_cast %50 : vector<128xf32> to vector<1x128xf32>
    %52 = tpu.reciprocal %48 {approx = true} : vector<1x128xf32> -> vector<1x128xf32>
    %53 = arith.mulf %48, %52 : vector<1x128xf32>
    %cst_32 = arith.constant 2.000000e+00 : f32
    %54 = vector.broadcast %cst_32 : f32 to vector<1x128xf32>
    %55 = arith.subf %54, %53 : vector<1x128xf32>
    %56 = arith.mulf %52, %55 : vector<1x128xf32>
    %57 = arith.mulf %51, %56 : vector<1x128xf32>
    %58 = arith.addf %28, %57 : vector<1x128xf32>
    %c0_33 = arith.constant 0 : index
    %c0_34 = arith.constant 0 : index
    %c2 = arith.constant 2 : index
    %c0_35 = arith.constant 0 : index
    %c0_36 = arith.constant 0 : index
    %59 = vector.load %arg1[%c0_33, %c0_34, %c2, %c0_35, %c0_36] : memref<1x2x3x16x128xf32, #tpu.memory_space<vmem>>, vector<1x1x1x16x128xf32>
    %60 = vector.shape_cast %59 : vector<1x1x1x16x128xf32> to vector<16x128xf32>
    %61 = arith.mulf %60, %60 : vector<16x128xf32>
    %62 = tpu.concatenate %61, %60 in 0 : vector<16x128xf32>, vector<16x128xf32> -> vector<32x128xf32>
    %c0_37 = arith.constant 0 : index
    %c2_38 = arith.constant 2 : index
    %c0_39 = arith.constant 0 : index
    %c0_40 = arith.constant 0 : index
    %63 = vector.load %arg2[%c0_37, %c2_38, %c0_39, %c0_40] : memref<2x3x8x32xf32, #tpu.memory_space<vmem>>, vector<1x1x8x32xf32>
    %64 = vector.shape_cast %63 : vector<1x1x8x32xf32> to vector<8x32xf32>
    %cst_41 = arith.constant dense<0.000000e+00> : vector<8x128xf32>
    %65 = tpu.matmul %64, %62, %cst_41 {dimension_numbers = #tpu.dot_dimension_numbers<[1], [0], [0], [1], [0, 0, 1, 1], [], []>, precision = #tpu.contract_precision<fp32>} : vector<8x32xf32>, vector<32x128xf32>, vector<8x128xf32> -> vector<8x128xf32>
    %c0_42 = arith.constant 0 : index
    %c2_43 = arith.constant 2 : index
    %c0_44 = arith.constant 0 : index
    %c0_45 = arith.constant 0 : index
    %66 = vector.load %arg3[%c0_42, %c2_43, %c0_44, %c0_45] : memref<2x3x8x1xf32, #tpu.memory_space<vmem>>, vector<1x1x8x1xf32>
    %67 = vector.shape_cast %66 : vector<1x1x8x1xf32> to vector<8x1xf32>
    %68 = vector.broadcast %67 : vector<8x1xf32> to vector<8x128xf32>
    %69 = arith.addf %65, %68 : vector<8x128xf32>
    %70 = vector.extract_strided_slice %69 {offsets = [0, 0], sizes = [4, 128], strides = [1, 1]} : vector<8x128xf32> to vector<4x128xf32>
    %71 = vector.extract_strided_slice %69 {offsets = [4, 0], sizes = [4, 128], strides = [1, 1]} : vector<8x128xf32> to vector<4x128xf32>
    %cst_46 = arith.constant dense<0xFF800000> : vector<128xf32>
    %72 = vector.multi_reduction <maximumf>, %70, %cst_46 [0] : vector<4x128xf32> to vector<128xf32>
    %73 = vector.shape_cast %72 : vector<128xf32> to vector<1x128xf32>
    %74 = vector.broadcast %73 : vector<1x128xf32> to vector<4x128xf32>
    %75 = arith.subf %70, %74 : vector<4x128xf32>
    %76 = math.exp %75 : vector<4x128xf32>
    %cst_47 = arith.constant dense<0.000000e+00> : vector<128xf32>
    %77 = vector.multi_reduction <add>, %76, %cst_47 [0] : vector<4x128xf32> to vector<128xf32>
    %78 = vector.shape_cast %77 : vector<128xf32> to vector<1x128xf32>
    %79 = arith.mulf %76, %71 : vector<4x128xf32>
    %cst_48 = arith.constant dense<0.000000e+00> : vector<128xf32>
    %80 = vector.multi_reduction <add>, %79, %cst_48 [0] : vector<4x128xf32> to vector<128xf32>
    %81 = vector.shape_cast %80 : vector<128xf32> to vector<1x128xf32>
    %82 = tpu.reciprocal %78 {approx = true} : vector<1x128xf32> -> vector<1x128xf32>
    %83 = arith.mulf %78, %82 : vector<1x128xf32>
    %cst_49 = arith.constant 2.000000e+00 : f32
    %84 = vector.broadcast %cst_49 : f32 to vector<1x128xf32>
    %85 = arith.subf %84, %83 : vector<1x128xf32>
    %86 = arith.mulf %82, %85 : vector<1x128xf32>
    %87 = arith.mulf %81, %86 : vector<1x128xf32>
    %88 = arith.addf %58, %87 : vector<1x128xf32>
    %c0_50 = arith.constant 0 : index
    %89 = memref.load %arg4[%c0_50] : memref<2xf32, #tpu.memory_space<smem>>
    %90 = vector.broadcast %89 : f32 to vector<1x128xf32>
    %91 = arith.addf %88, %90 : vector<1x128xf32>
    %c0_51 = arith.constant 0 : index
    %c1_52 = arith.constant 1 : index
    %c0_53 = arith.constant 0 : index
    %c0_54 = arith.constant 0 : index
    %c0_55 = arith.constant 0 : index
    %92 = vector.load %arg1[%c0_51, %c1_52, %c0_53, %c0_54, %c0_55] : memref<1x2x3x16x128xf32, #tpu.memory_space<vmem>>, vector<1x1x1x16x128xf32>
    %93 = vector.shape_cast %92 : vector<1x1x1x16x128xf32> to vector<16x128xf32>
    %94 = arith.mulf %93, %93 : vector<16x128xf32>
    %95 = tpu.concatenate %94, %93 in 0 : vector<16x128xf32>, vector<16x128xf32> -> vector<32x128xf32>
    %c1_56 = arith.constant 1 : index
    %c0_57 = arith.constant 0 : index
    %c0_58 = arith.constant 0 : index
    %c0_59 = arith.constant 0 : index
    %96 = vector.load %arg2[%c1_56, %c0_57, %c0_58, %c0_59] : memref<2x3x8x32xf32, #tpu.memory_space<vmem>>, vector<1x1x8x32xf32>
    %97 = vector.shape_cast %96 : vector<1x1x8x32xf32> to vector<8x32xf32>
    %cst_60 = arith.constant dense<0.000000e+00> : vector<8x128xf32>
    %98 = tpu.matmul %97, %95, %cst_60 {dimension_numbers = #tpu.dot_dimension_numbers<[1], [0], [0], [1], [0, 0, 1, 1], [], []>, precision = #tpu.contract_precision<fp32>} : vector<8x32xf32>, vector<32x128xf32>, vector<8x128xf32> -> vector<8x128xf32>
    %c1_61 = arith.constant 1 : index
    %c0_62 = arith.constant 0 : index
    %c0_63 = arith.constant 0 : index
    %c0_64 = arith.constant 0 : index
    %99 = vector.load %arg3[%c1_61, %c0_62, %c0_63, %c0_64] : memref<2x3x8x1xf32, #tpu.memory_space<vmem>>, vector<1x1x8x1xf32>
    %100 = vector.shape_cast %99 : vector<1x1x8x1xf32> to vector<8x1xf32>
    %101 = vector.broadcast %100 : vector<8x1xf32> to vector<8x128xf32>
    %102 = arith.addf %98, %101 : vector<8x128xf32>
    %103 = vector.extract_strided_slice %102 {offsets = [0, 0], sizes = [4, 128], strides = [1, 1]} : vector<8x128xf32> to vector<4x128xf32>
    %104 = vector.extract_strided_slice %102 {offsets = [4, 0], sizes = [4, 128], strides = [1, 1]} : vector<8x128xf32> to vector<4x128xf32>
    %cst_65 = arith.constant dense<0xFF800000> : vector<128xf32>
    %105 = vector.multi_reduction <maximumf>, %103, %cst_65 [0] : vector<4x128xf32> to vector<128xf32>
    %106 = vector.shape_cast %105 : vector<128xf32> to vector<1x128xf32>
    %107 = vector.broadcast %106 : vector<1x128xf32> to vector<4x128xf32>
    %108 = arith.subf %103, %107 : vector<4x128xf32>
    %109 = math.exp %108 : vector<4x128xf32>
    %cst_66 = arith.constant dense<0.000000e+00> : vector<128xf32>
    %110 = vector.multi_reduction <add>, %109, %cst_66 [0] : vector<4x128xf32> to vector<128xf32>
    %111 = vector.shape_cast %110 : vector<128xf32> to vector<1x128xf32>
    %112 = arith.mulf %109, %104 : vector<4x128xf32>
    %cst_67 = arith.constant dense<0.000000e+00> : vector<128xf32>
    %113 = vector.multi_reduction <add>, %112, %cst_67 [0] : vector<4x128xf32> to vector<128xf32>
    %114 = vector.shape_cast %113 : vector<128xf32> to vector<1x128xf32>
    %115 = tpu.reciprocal %111 {approx = true} : vector<1x128xf32> -> vector<1x128xf32>
    %116 = arith.mulf %111, %115 : vector<1x128xf32>
    %cst_68 = arith.constant 2.000000e+00 : f32
    %117 = vector.broadcast %cst_68 : f32 to vector<1x128xf32>
    %118 = arith.subf %117, %116 : vector<1x128xf32>
    %119 = arith.mulf %115, %118 : vector<1x128xf32>
    %120 = arith.mulf %114, %119 : vector<1x128xf32>
    %c0_69 = arith.constant 0 : index
    %c1_70 = arith.constant 1 : index
    %c1_71 = arith.constant 1 : index
    %c0_72 = arith.constant 0 : index
    %c0_73 = arith.constant 0 : index
    %121 = vector.load %arg1[%c0_69, %c1_70, %c1_71, %c0_72, %c0_73] : memref<1x2x3x16x128xf32, #tpu.memory_space<vmem>>, vector<1x1x1x16x128xf32>
    %122 = vector.shape_cast %121 : vector<1x1x1x16x128xf32> to vector<16x128xf32>
    %123 = arith.mulf %122, %122 : vector<16x128xf32>
    %124 = tpu.concatenate %123, %122 in 0 : vector<16x128xf32>, vector<16x128xf32> -> vector<32x128xf32>
    %c1_74 = arith.constant 1 : index
    %c1_75 = arith.constant 1 : index
    %c0_76 = arith.constant 0 : index
    %c0_77 = arith.constant 0 : index
    %125 = vector.load %arg2[%c1_74, %c1_75, %c0_76, %c0_77] : memref<2x3x8x32xf32, #tpu.memory_space<vmem>>, vector<1x1x8x32xf32>
    %126 = vector.shape_cast %125 : vector<1x1x8x32xf32> to vector<8x32xf32>
    %cst_78 = arith.constant dense<0.000000e+00> : vector<8x128xf32>
    %127 = tpu.matmul %126, %124, %cst_78 {dimension_numbers = #tpu.dot_dimension_numbers<[1], [0], [0], [1], [0, 0, 1, 1], [], []>, precision = #tpu.contract_precision<fp32>} : vector<8x32xf32>, vector<32x128xf32>, vector<8x128xf32> -> vector<8x128xf32>
    %c1_79 = arith.constant 1 : index
    %c1_80 = arith.constant 1 : index
    %c0_81 = arith.constant 0 : index
    %c0_82 = arith.constant 0 : index
    %128 = vector.load %arg3[%c1_79, %c1_80, %c0_81, %c0_82] : memref<2x3x8x1xf32, #tpu.memory_space<vmem>>, vector<1x1x8x1xf32>
    %129 = vector.shape_cast %128 : vector<1x1x8x1xf32> to vector<8x1xf32>
    %130 = vector.broadcast %129 : vector<8x1xf32> to vector<8x128xf32>
    %131 = arith.addf %127, %130 : vector<8x128xf32>
    %132 = vector.extract_strided_slice %131 {offsets = [0, 0], sizes = [4, 128], strides = [1, 1]} : vector<8x128xf32> to vector<4x128xf32>
    %133 = vector.extract_strided_slice %131 {offsets = [4, 0], sizes = [4, 128], strides = [1, 1]} : vector<8x128xf32> to vector<4x128xf32>
    %cst_83 = arith.constant dense<0xFF800000> : vector<128xf32>
    %134 = vector.multi_reduction <maximumf>, %132, %cst_83 [0] : vector<4x128xf32> to vector<128xf32>
    %135 = vector.shape_cast %134 : vector<128xf32> to vector<1x128xf32>
    %136 = vector.broadcast %135 : vector<1x128xf32> to vector<4x128xf32>
    %137 = arith.subf %132, %136 : vector<4x128xf32>
    %138 = math.exp %137 : vector<4x128xf32>
    %cst_84 = arith.constant dense<0.000000e+00> : vector<128xf32>
    %139 = vector.multi_reduction <add>, %138, %cst_84 [0] : vector<4x128xf32> to vector<128xf32>
    %140 = vector.shape_cast %139 : vector<128xf32> to vector<1x128xf32>
    %141 = arith.mulf %138, %133 : vector<4x128xf32>
    %cst_85 = arith.constant dense<0.000000e+00> : vector<128xf32>
    %142 = vector.multi_reduction <add>, %141, %cst_85 [0] : vector<4x128xf32> to vector<128xf32>
    %143 = vector.shape_cast %142 : vector<128xf32> to vector<1x128xf32>
    %144 = tpu.reciprocal %140 {approx = true} : vector<1x128xf32> -> vector<1x128xf32>
    %145 = arith.mulf %140, %144 : vector<1x128xf32>
    %cst_86 = arith.constant 2.000000e+00 : f32
    %146 = vector.broadcast %cst_86 : f32 to vector<1x128xf32>
    %147 = arith.subf %146, %145 : vector<1x128xf32>
    %148 = arith.mulf %144, %147 : vector<1x128xf32>
    %149 = arith.mulf %143, %148 : vector<1x128xf32>
    %150 = arith.addf %120, %149 : vector<1x128xf32>
    %c0_87 = arith.constant 0 : index
    %c1_88 = arith.constant 1 : index
    %c2_89 = arith.constant 2 : index
    %c0_90 = arith.constant 0 : index
    %c0_91 = arith.constant 0 : index
    %151 = vector.load %arg1[%c0_87, %c1_88, %c2_89, %c0_90, %c0_91] : memref<1x2x3x16x128xf32, #tpu.memory_space<vmem>>, vector<1x1x1x16x128xf32>
    %152 = vector.shape_cast %151 : vector<1x1x1x16x128xf32> to vector<16x128xf32>
    %153 = arith.mulf %152, %152 : vector<16x128xf32>
    %154 = tpu.concatenate %153, %152 in 0 : vector<16x128xf32>, vector<16x128xf32> -> vector<32x128xf32>
    %c1_92 = arith.constant 1 : index
    %c2_93 = arith.constant 2 : index
    %c0_94 = arith.constant 0 : index
    %c0_95 = arith.constant 0 : index
    %155 = vector.load %arg2[%c1_92, %c2_93, %c0_94, %c0_95] : memref<2x3x8x32xf32, #tpu.memory_space<vmem>>, vector<1x1x8x32xf32>
    %156 = vector.shape_cast %155 : vector<1x1x8x32xf32> to vector<8x32xf32>
    %cst_96 = arith.constant dense<0.000000e+00> : vector<8x128xf32>
    %157 = tpu.matmul %156, %154, %cst_96 {dimension_numbers = #tpu.dot_dimension_numbers<[1], [0], [0], [1], [0, 0, 1, 1], [], []>, precision = #tpu.contract_precision<fp32>} : vector<8x32xf32>, vector<32x128xf32>, vector<8x128xf32> -> vector<8x128xf32>
    %c1_97 = arith.constant 1 : index
    %c2_98 = arith.constant 2 : index
    %c0_99 = arith.constant 0 : index
    %c0_100 = arith.constant 0 : index
    %158 = vector.load %arg3[%c1_97, %c2_98, %c0_99, %c0_100] : memref<2x3x8x1xf32, #tpu.memory_space<vmem>>, vector<1x1x8x1xf32>
    %159 = vector.shape_cast %158 : vector<1x1x8x1xf32> to vector<8x1xf32>
    %160 = vector.broadcast %159 : vector<8x1xf32> to vector<8x128xf32>
    %161 = arith.addf %157, %160 : vector<8x128xf32>
    %162 = vector.extract_strided_slice %161 {offsets = [0, 0], sizes = [4, 128], strides = [1, 1]} : vector<8x128xf32> to vector<4x128xf32>
    %163 = vector.extract_strided_slice %161 {offsets = [4, 0], sizes = [4, 128], strides = [1, 1]} : vector<8x128xf32> to vector<4x128xf32>
    %cst_101 = arith.constant dense<0xFF800000> : vector<128xf32>
    %164 = vector.multi_reduction <maximumf>, %162, %cst_101 [0] : vector<4x128xf32> to vector<128xf32>
    %165 = vector.shape_cast %164 : vector<128xf32> to vector<1x128xf32>
    %166 = vector.broadcast %165 : vector<1x128xf32> to vector<4x128xf32>
    %167 = arith.subf %162, %166 : vector<4x128xf32>
    %168 = math.exp %167 : vector<4x128xf32>
    %cst_102 = arith.constant dense<0.000000e+00> : vector<128xf32>
    %169 = vector.multi_reduction <add>, %168, %cst_102 [0] : vector<4x128xf32> to vector<128xf32>
    %170 = vector.shape_cast %169 : vector<128xf32> to vector<1x128xf32>
    %171 = arith.mulf %168, %163 : vector<4x128xf32>
    %cst_103 = arith.constant dense<0.000000e+00> : vector<128xf32>
    %172 = vector.multi_reduction <add>, %171, %cst_103 [0] : vector<4x128xf32> to vector<128xf32>
    %173 = vector.shape_cast %172 : vector<128xf32> to vector<1x128xf32>
    %174 = tpu.reciprocal %170 {approx = true} : vector<1x128xf32> -> vector<1x128xf32>
    %175 = arith.mulf %170, %174 : vector<1x128xf32>
    %cst_104 = arith.constant 2.000000e+00 : f32
    %176 = vector.broadcast %cst_104 : f32 to vector<1x128xf32>
    %177 = arith.subf %176, %175 : vector<1x128xf32>
    %178 = arith.mulf %174, %177 : vector<1x128xf32>
    %179 = arith.mulf %173, %178 : vector<1x128xf32>
    %180 = arith.addf %150, %179 : vector<1x128xf32>
    %c1_105 = arith.constant 1 : index
    %181 = memref.load %arg4[%c1_105] : memref<2xf32, #tpu.memory_space<smem>>
    %182 = vector.broadcast %181 : f32 to vector<1x128xf32>
    %183 = arith.addf %180, %182 : vector<1x128xf32>
    %184 = tpu.concatenate %91, %183 in 0 : vector<1x128xf32>, vector<1x128xf32> -> vector<2x128xf32>
    %cst_106 = arith.constant dense<0xFF800000> : vector<128xf32>
    %185 = vector.multi_reduction <maximumf>, %184, %cst_106 [0] : vector<2x128xf32> to vector<128xf32>
    %186 = vector.shape_cast %185 : vector<128xf32> to vector<1x128xf32>
    %187 = vector.broadcast %186 : vector<1x128xf32> to vector<2x128xf32>
    %188 = arith.subf %184, %187 : vector<2x128xf32>
    %189 = math.exp %188 : vector<2x128xf32>
    %cst_107 = arith.constant dense<0.000000e+00> : vector<128xf32>
    %190 = vector.multi_reduction <add>, %189, %cst_107 [0] : vector<2x128xf32> to vector<128xf32>
    %191 = vector.shape_cast %190 : vector<128xf32> to vector<1x128xf32>
    %192 = tpu.reciprocal %191 {approx = true} : vector<1x128xf32> -> vector<1x128xf32>
    %193 = arith.mulf %191, %192 : vector<1x128xf32>
    %cst_108 = arith.constant 2.000000e+00 : f32
    %194 = vector.broadcast %cst_108 : f32 to vector<1x128xf32>
    %195 = arith.subf %194, %193 : vector<1x128xf32>
    %196 = arith.mulf %192, %195 : vector<1x128xf32>
    %197 = vector.broadcast %196 : vector<1x128xf32> to vector<2x128xf32>
    %198 = arith.mulf %189, %197 : vector<2x128xf32>
    %c0_109 = arith.constant 0 : index
    %c0_110 = arith.constant 0 : index
    %199 = vector.load %arg5[%c0_109, %c0_110] : memref<2x128xf32, #tpu.memory_space<vmem>>, vector<2x128xf32>
    tpu.vector_store %arg5[%c0_109, %c0_110], %198 {strides = array<i32>} : memref<2x128xf32, #tpu.memory_space<vmem>>, vector<2x128xf32>,
    return
  }
  func.func @transform_0(%arg0: i32) -> (i32, i32, i32, i32, i32) {
    %c0_i32 = arith.constant 0 : i32
    %c0_i32_0 = arith.constant 0 : i32
    %c0_i32_1 = arith.constant 0 : i32
    %c0_i32_2 = arith.constant 0 : i32
    %c0_i32_3 = arith.constant 0 : i32
    return %arg0, %c0_i32, %c0_i32_0, %c0_i32_1, %c0_i32_2 : i32, i32, i32, i32, i32
  }
  func.func @transform_1(%arg0: i32) -> (i32, i32, i32, i32) {
    %c0_i32 = arith.constant 0 : i32
    %c0_i32_0 = arith.constant 0 : i32
    %c0_i32_1 = arith.constant 0 : i32
    %c0_i32_2 = arith.constant 0 : i32
    %c0_i32_3 = arith.constant 0 : i32
    return %c0_i32, %c0_i32_0, %c0_i32_1, %c0_i32_2 : i32, i32, i32, i32
  }
  func.func @transform_2(%arg0: i32) -> (i32, i32, i32, i32) {
    %c0_i32 = arith.constant 0 : i32
    %c0_i32_0 = arith.constant 0 : i32
    %c0_i32_1 = arith.constant 0 : i32
    %c0_i32_2 = arith.constant 0 : i32
    %c0_i32_3 = arith.constant 0 : i32
    return %c0_i32, %c0_i32_0, %c0_i32_1, %c0_i32_2 : i32, i32, i32, i32
  }
  func.func @transform_3(%arg0: i32) -> i32 {
    %c0_i32 = arith.constant 0 : i32
    %c0_i32_0 = arith.constant 0 : i32
    return %c0_i32 : i32
  }
  func.func @transform_4(%arg0: i32) -> (i32, i32) {
    %c0_i32 = arith.constant 0 : i32
    %c0_i32_0 = arith.constant 0 : i32
    return %c0_i32, %arg0 : i32, i32
  }
}

</mosaic_0001>

<bundles_post_ra>
// kernel: tpu_custom_call.1
= control target key start
LH: loop header
LB: loop body
LE: loop exit
PB: predicated region body
PF: predicated region fallthrough
CT: control target
= control target key end

     0   :  { %9 = vsyncpa [#allocation3], 0  ;;  %s5537_s0 = inlined_call_operand.hbm [shape: f32[2,2,3,16,128], index: 0, kind: input, shape index: {}]   ;;  %s5538_s1 = inlined_call_operand.vmem [shape: f32[2,3,8,32], index: 1, kind: input, shape index: {}]   ;;  %s5539_s2 = inlined_call_operand.vmem [shape: f32[2,3,8,1], index: 2, kind: input, shape index: {}]   ;;  %s5540_s3 = inlined_call_operand.vmem [shape: f32[2], index: 3, kind: input, shape index: {}]   ;;  %s5541_s4 = inlined_call_operand.hbm [shape: f32[2,256], index: 4, kind: output, shape index: {}]  }
   0x1   :  { %11 = vsyncpa [#allocation3 + $0x1], 0 }
   0x2   :  { %12 = vsyncpa [#allocation5], 0 }
   0x3   :  { %13 = vsyncpa [#allocation4], 0 }
   0x4   :  { %15 = vsyncpa [#allocation4 + $0x1], 0  ;;  %s4709_s15 = smov 0   ;;  %s4711_s16 = smov 0  }
   0x5   :  { %s4713_s17 = smov 0   ;;  %s4715_s18 = smov 0  }
   0x6 LB: > { %s4730_s19 = sadd.s32 4294967295, %s4673_s18   ;;  %s3571_s20 = sadd.s32 4294967294, %s4673_s18   ;;  %s4673_s18 = sphi %s4715_s18, %s5561_s18   ;;  %s4669_s17 = sphi %s4713_s17, %s5560_s17   ;;  %s4665_s16 = sphi %s4711_s16, %s5559_s16   ;;  %s4661_s15 = sphi %s4709_s15, %s5558_s15  }
   0x7   : > { %s4734_s21 = sadd.s32 1, %s4673_s18   ;;  %s28_s22 = sadd.s32 1, %s4669_s17 }
   0x8   : > { %s25_s23 = ssub.s32 %s4673_s18, %s4734_s21  ;;  %p35_p0 = scmp.ne.s32.totalorder %s4669_s17, %s4665_s16 }
   0x9   : > { %p26_p1 = scmp.eq.s32.totalorder %s25_s23, 0  ;;  %p36_p2 = scmp.eq.s32.totalorder %s4673_s18, 0 }
   0xa   : > { %p41_p3 = scmp.ne.s32.totalorder %s4665_s16, %s4661_s15  ;;  %p5543_p4 = scmp.eq.s32.totalorder %s4730_s19, 0 }
   0xb   : > { %s4746_s24 = scalar_select %p26_p1, %s4669_s17, %s28_s22  }
   0xc   : > { %p4748_p5 = por %p36_p2, %p35_p0  ;;  %p4754_p6 = por %p5543_p4, %p41_p3 }
   0xd   : > { %p128_p7 = scmp.eq.s32.totalorder %s4730_s19, 1  ;;  %p134_p8 = scmp.eq.s32.totalorder %s3571_s20, 1 }
   0xe   : > { %s5546_s26 = scalar_select %p4754_p6, 1, 0 }
   0xf   : > { %p3572_p9 = scmp.ge.s32.totalorder %s4673_s18, 1  ;;  %p141_p10 = scmp.lt.s32.totalorder %s4673_s18, 3 }
  0x10   : > { %p4761_p11 = por %p128_p7, %p35_p0  ;;  %p4765_p12 = por %p134_p8, %p41_p3 }
  0x11   : > { %p4769_p13 = pnand %p3572_p9, %p141_p10  ;;  %s160_s6 = sshll.u32 %s5540_s3, 4  ;;  %s161_s6 = int_to_ptr.vmem [resolvable:$true] %s160_s6 }
  0x12   : > { %s5547_s27 = scalar_select %p4761_p11, 1, 0 }
  0x13   : > { %s5548_s28 = scalar_select %p4765_p12, 1, 0 }
  0x14   : > { %p4473_p1 = pneg %p4769_p13  ;;  %p4486_p2 = scmp.lt.s32.totalorder %s4673_s18, 2 }
  0x15   : > { %s171_s8 = sand.u32 1, %s4669_s17   ;;  %s4558_s11 = scalar_lea.vmem %s161_s6, 16 }
  0x16   : > { %p4782_p7 = pnand %p4473_p1, %p5543_p4  ;;  %p4789_p3 = pnand %p4486_p2, %p4748_p5 }
  0x17   : > { %s4462_s10 = smul.u32 96, %s171_s8  ;;  %p4559_p8 = scmp.ne.s32.totalorder %s161_s6, %s4558_s11 }
  0x18   : > { %p4560_p9 = pneg %p4782_p7  ;;  %p4566_p12 = scmp.lt.s32.totalorder %s161_s6, %s161_s6 }
  0x19   : > { %p4567_p11 = scmp.lt.s32.totalorder %s4558_s11, %s4558_s11 }
  0x1a   : > { %p4561_p10 = pnand %p4560_p9, %p4559_p8 }
  0x1b   : > { %p4568_p1 = por %p4567_p11, %p4566_p12 }
  0x1c   : > { %p4562_p0 = pneg %p4561_p10 }
  0x1e   : > { %p4569_p4 = pnand %p4568_p1, %p4562_p0 }
  0x20   : > { %4572 = shalt.err (!%p4569_p4)
}
  0x21   : > { %s4675_s12 = smov [#allocation6]   ;;  %s4463_s13 = smul.u32 1536, %s4673_s18 }
  0x22   : > { %4476 = dma.vmem_to_smem (!%p4782_p7), %s161_s6, 16, %s4675_s12, [#allocation5]  }
  0x23   : > { %s175_s14 = scalar_lea.vmem [#allocation2], %s4462_s10  ;;  %s4803_s25 = scalar_lea.hbm %s5537_s0, %s4463_s13 }
  0x24   : > { %s182_s20 = sshll.u32 %s175_s14, 4  ;;  %s4805_s30 = scalar_lea.sflag [#allocation3], %s171_s8  ;;  %s4798_s20 = int_to_ptr.vmem [resolvable:$true] %s182_s20 }
  0x25   : > { %s4573_s5 = scalar_lea.hbm %s4803_s25, 1536  ;;  %p4575_p5 = pneg %p4789_p3 }
  0x26   : > { %p4574_p4 = scmp.ne.s32.totalorder %s4803_s25, %s4573_s5  ;;  %s4578_s10 = scalar_lea.hbm %s5537_s0, 3072 }
  0x27   : > { %p4579_p0 = scmp.lt.u32.totalorder %s4803_s25, %s5537_s0  ;;  %p4580_p2 = scmp.lt.u32.totalorder %s4578_s10, %s4573_s5 }
  0x28   : > { %p4576_p11 = pnand %p4575_p5, %p4574_p4  ;;  %p4582_p8 = scmp.lt.u32.totalorder %s4573_s5, %s4803_s25 }
  0x29   : > { %p4581_p7 = por %p4580_p2, %p4579_p0 }
  0x2a   : > { %p4577_p12 = pneg %p4576_p11 }
  0x2b   : > { %p4583_p9 = por %p4582_p8, %p4581_p7 }
  0x2d   : > { %p4584_p10 = pnand %p4583_p9, %p4577_p12 }
  0x2f   : > { %4587 = shalt.err (!%p4584_p10)
}
  0x30   : > { %s4588_s8 = scalar_lea.vmem %s4798_s20, 1536  ;;  %s4676_s13 = smov [#allocation2]  }
  0x31   : > { %p4589_p1 = scmp.ne.s32.totalorder %s4798_s20, %s4588_s8  ;;  %s4593_s14 = sshll.u32 %s4676_s13, 4  ;;  %s4594_s14 = int_to_ptr.vmem [resolvable:$false] %s4593_s14 }
  0x32   : > { %s4595_s22 = scalar_lea.vmem %s4594_s14, 3072  ;;  %p4596_p6 = scmp.lt.s32.totalorder %s4798_s20, %s4594_s14 }
  0x33   : > { %p4591_p4 = pnand %p4589_p1, %p4575_p5  ;;  %p4597_p0 = scmp.lt.s32.totalorder %s4595_s22, %s4588_s8 }
  0x35   : > { %p4592_p11 = pneg %p4591_p4  ;;  %p4598_p2 = por %p4597_p0, %p4596_p6 }
  0x37   : > { %p4599_p7 = pnand %p4598_p2, %p4592_p11 }
  0x39   : > { %4602 = shalt.err (!%p4599_p7)
}
  0x3a   : > { %s4677_s23 = smov 128   ;;  %s4678_s5 = smov 8  }
  0x3b   : > { %4480 = dma.hbm_to_vmem [thread:$0]  (!%p4789_p3), %s4803_s25, 1536, %s4798_s20, %s4805_s30, %s4677_s23, %s4677_s23, %s4678_s5  }
  0x3c   : > { %194 = sbr.rel (%p4769_p13) target bundleno = 583 (0x247), region = 36  ;;  %s4836_s6 = sand.u32 (!%p4769_p13), 1, %s4665_s16  }
  0x3d   : > { %s4464_s7 = smul.u32 (!%p4769_p13), 96, %s4836_s6  ;;  %s197_s10 = scalar_lea.sflag (!%p4769_p13), [#allocation3], %s4836_s6 }
  0x3e   : > { %p5552_p6 = scmp.ne.s32.totalorder (!%p4769_p13), %s5546_s26, 0 }
  0x3f   : > { %s4840_s11 = scalar_lea.vmem (!%p4769_p13), [#allocation2], %s4464_s7 }
  0x43   : > { %4648 = dma.done.wait (%p5552_p6), %s197_s10, 1536  }
  0x44   : > { %4650 = vsyncadd (%p5552_p6), %s197_s10, 4294965760  ;;  %p5553_p3 = scmp.eq.s32.totalorder %s4730_s19, 0 }
  0x46   : > { %4652 = dma.done.wait (%p5553_p3), [#allocation5], 16   ;;  %p5554_p13 = pmov %p5553_p3 }
  0x48   : > { %4654 = vsyncadd (%p5554_p13), [#allocation5], 4294967280 }
  0x49   : > { %209 = sfence }
  0x4a   : > { %v230_v0 = vld [vmem:[%s4840_s11] sm:$0xff]  ;;  %v231_v1 = vld [vmem:[%s4840_s11 + $0x8] sm:$0xff]  ;;  %v3579_v2 = vld [vmem:[%s4840_s11 + $0x10] sm:$0xff]  ;;  %v4679_v3 = vmov 0.0|0.0   ;;  %vm4680_vm0 = vmmov 0   ;;  %v4681_v13 = vmov 0.0  }
  0x4b   : > { %4180 = vmatprep.subr.bf16.mxu0 %v4679_v3  ;;  %4216 = vmatprep.subr.bf16.mxu1 %v4679_v3  ;;  %v232_v4 = vmul.f32 %v230_v0, %v230_v0  ;;  %v233_v5 = vmul.f32 %v231_v1, %v231_v1  ;;  %v3580_v6 = vld [vmem:[%s4840_s11 + $0x18] sm:$0xff]  ;;  %v767_v7 = vmul.f32 %v3579_v2, %v3579_v2  ;;  %v252_v8 = vand.u32 4294901760, %v230_v0  ;;  %v234_v25 = vld [vmem:[%s5538_s1] sm:$0xff]  ;;  %v3581_v26 = vld [vmem:[%s5538_s1 + $0x8] sm:$0xff]  ;;  %s1836_s13 = sld [smem:[#allocation6]]  ;;  %s3599_s14 = sld [smem:[#allocation6 + $0x1]] }
  0x4c   : > { %v768_v9 = vmul.f32 %v3580_v6, %v3580_v6  ;;  %v255_v10 = vand.u32 4294901760, %v231_v1  ;;  %v788_v11 = vand.u32 4294901760, %v3579_v2  ;;  %v791_v12 = vand.u32 4294901760, %v3580_v6  ;;  %3792 = vmatprep.mubr.msk.f32.mxu0 %vm4680_vm0, %v4681_v13  ;;  %3858 = vmatprep.mubr.msk.f32.mxu1 %vm4680_vm0, %v4681_v13  ;;  %s3578_s22 = sshll.u32 %s4836_s6, 1  ;;  %s3601_s23 = sshll.u32 %s4730_s19, 5 }
  0x4d   : > { %v246_v14 = vand.u32 4294901760, %v232_v4  ;;  %v249_v15 = vand.u32 4294901760, %v233_v5  ;;  %v782_v16 = vand.u32 4294901760, %v767_v7  ;;  %v4862_v19 = vsub.f32 %v230_v0, %v252_v8  ;;  %s229_s5 = scalar_lea.vmem [#allocation7], %s3578_s22  ;;  %s5493_s29 = scalar_lea.hbm %s5541_s4, %s3601_s23 }
  0x4e   : > { %v785_v17 = vand.u32 4294901760, %v768_v9  ;;  %v4860_v18 = vpack.c.bf16 %v255_v10, %v252_v8  ;;  %v4864_v20 = vsub.f32 %v231_v1, %v255_v10  ;;  %v4884_v29 = vpack.c.bf16 %v791_v12, %v788_v11  ;;  %s3489_s7 = sshll.u32 %s229_s5, 4  ;;  %s3476_s9 = scalar_lea.sflag [#allocation4], %s4836_s6  ;;  %s5495_s7 = int_to_ptr.vmem [resolvable:$true] %s3489_s7 }
  0x4f   : > { %v4866_v21 = vpack.c.bf16 %v249_v15, %v246_v14  ;;  %v4868_v22 = vsub.f32 %v232_v4, %v246_v14  ;;  %v4870_v23 = vsub.f32 %v233_v5, %v249_v15  ;;  %v4872_v24 = vsub.f32 %v767_v7, %v782_v16  ;;  %v4979_v14 = vld [vmem:[%s4840_s11 + $0x20] sm:$0xff]  ;;  %v4984_v15 = vld [vmem:[%s4840_s11 + $0x28] sm:$0xff]  ;;  %s4603_s20 = scalar_lea.vmem %s5495_s7, 32  ;;  %p5555_p12 = scmp.ne.s32.totalorder %s5547_s27, 0 }
  0x50   : > { %v4880_v27 = vpack.c.bf16 %v785_v17, %v782_v16  ;;  %v4882_v28 = vsub.f32 %v768_v9, %v785_v17  ;;  %v4886_v30 = vsub.f32 %v3579_v2, %v788_v11  ;;  %vm241_vm1 = vcmask 261120   ;;  %v4989_v16 = vld [vmem:[%s4840_s11 + $0x30] sm:$0xff]  ;;  %v4992_v17 = vld [vmem:[%s4840_s11 + $0x38] sm:$0xff]  ;;  %p4604_p5 = scmp.ne.s32.totalorder %s5495_s7, %s4603_s20  ;;  %s4683_s19 = smov [#allocation7]  }
  0x51   : > { %4182 = vmatpush3.bf16.msra.mxu0 %v4866_v21  ;;  %v327_v31 = vand.u32 4294901760, %v4868_v22  ;;  %v334_v32 = vand.u32 4294901760, %v4870_v23  ;;  %v863_v33 = vand.u32 4294901760, %v4872_v24  ;;  %v243_v34 = vsel %vm241_vm1, %v234_v25, 0  ;;  %s4607_s25 = sshll.u32 %s4683_s19, 4  ;;  %s4608_s25 = int_to_ptr.vmem [resolvable:$false] %s4607_s25 }
  0x52   : > { %4218 = vmatpush3.bf16.msra.mxu1 %v4880_v27  ;;  %4183 = vmatprep.subr.bf16.mxu0 %v4679_v3  ;;  %v779_v35 = vsel %vm241_vm1, %v3581_v26, 0  ;;  %v870_v36 = vand.u32 4294901760, %v4882_v28  ;;  %v341_v37 = vand.u32 4294901760, %v4862_v19  ;;  %v4899_v38 = vand.u32 4294901760, %v243_v34  ;;  %p4605_p8 = pnand %p4604_p5, %p5555_p12  ;;  %p4610_p10 = scmp.lt.s32.totalorder %s5495_s7, %s4608_s25 }
  0x53   : > { %4219 = vmatprep.subr.bf16.mxu1 %v4679_v3  ;;  %v4901_v39 = vand.u32 4294901760, %v779_v35  ;;  %v328_v40 = vsub.f32 %v4868_v22, %v327_v31  ;;  %v335_v41 = vsub.f32 %v4870_v23, %v334_v32  ;;  %v4909_v42 = vsub.f32 %v3580_v6, %v791_v12 }
  0x54   : > { %v864_v43 = vsub.f32 %v4872_v24, %v863_v33  ;;  %v871_v44 = vsub.f32 %v4882_v28, %v870_v36  ;;  %v348_v45 = vand.u32 4294901760, %v4864_v20  ;;  %v4920_v46 = vsub.f32 %v243_v34, %v4899_v38  ;;  %p4606_p9 = pneg %p4605_p8 }
  0x55   : > { %4185 = vmatpush3.bf16.msra.mxu0 %v4860_v18  ;;  %v4923_v47 = vsub.f32 %v779_v35, %v4901_v39  ;;  %v329_v48 = vand.u32 4294901760, %v328_v40  ;;  %v342_v49 = vsub.f32 %v4862_v19, %v341_v37  ;;  %v336_v50 = vand.u32 4294901760, %v335_v41 }
  0x56   : > { %4221 = vmatpush3.bf16.msra.mxu1 %v4884_v29  ;;  %4186 = vmatprep.subr.bf16.mxu0 %v4679_v3  ;;  %v865_v51 = vand.u32 4294901760, %v864_v43  ;;  %v872_v52 = vand.u32 4294901760, %v871_v44  ;;  %v349_v53 = vsub.f32 %v4864_v20, %v348_v45  ;;  %v316_v54 = vand.u32 4294901760, %v4920_v46 }
  0x57   : > { %v852_v55 = vand.u32 4294901760, %v4923_v47  ;;  %4222 = vmatprep.subr.bf16.mxu1 %v4679_v3  ;;  %v877_v56 = vand.u32 4294901760, %v4886_v30  ;;  %v884_v57 = vand.u32 4294901760, %v4909_v42  ;;  %v343_v60 = vand.u32 4294901760, %v342_v49 }
  0x58   : > { %v317_v58 = vsub.f32 %v4920_v46, %v316_v54  ;;  %v4187_v62 = vpack.c.bf16 %v336_v50, %v329_v48  ;;  %v4223_v63 = vpack.c.bf16 %v872_v52, %v865_v51  ;;  %v350_v0 = vand.u32 4294901760, %v349_v53 }
  0x59   : > { %v853_v59 = vsub.f32 %v4923_v47, %v852_v55  ;;  %v878_v61 = vsub.f32 %v4886_v30, %v877_v56  ;;  %v885_v1 = vsub.f32 %v4909_v42, %v884_v57  ;;  %v4193_v9 = vpack.c.bf16 %v4870_v23, %v4868_v22  ;;  %v3585_v23 = vld [vmem:[%s5538_s1 + $0x10] sm:$0xff] }
  0x5a   : > { %v318_v2 = vand.u32 4294901760, %v317_v58  ;;  %v4190_v7 = vpack.c.bf16 %v350_v0, %v343_v60  ;;  %v4229_v10 = vpack.c.bf16 %v4882_v28, %v4872_v24  ;;  %v4196_v11 = vpack.c.bf16 %v4864_v20, %v4862_v19  ;;  %v3589_v24 = vld [vmem:[%s5538_s1 + $0x18] sm:$0xff] }
  0x5b   : > { %v854_v4 = vand.u32 4294901760, %v853_v59  ;;  %v879_v5 = vand.u32 4294901760, %v878_v61  ;;  %v886_v6 = vand.u32 4294901760, %v885_v1  ;;  %v4232_v12 = vpack.c.bf16 %v4909_v42, %v4886_v30 }
  0x5c   : > { %3793 = vmatmul.mubr.f32.vlgmr.msra.gmra.mrb[0].mxu0 %v318_v2  ;;  %v1303_v25 = vmul.f32 %v4979_v14, %v4979_v14  ;;  %v4205_v26 = vpack.c.bf16 %v334_v32, %v327_v31  ;;  %v1304_v34 = vmul.f32 %v4984_v15, %v4984_v15  ;;  %v4241_v35 = vpack.c.bf16 %v870_v36, %v863_v33 }
  0x5d   : > { %3859 = vmatmul.mubr.f32.vlgmr.msra.gmra.mrb[0].mxu1 %v854_v4  ;;  %4188 = vmatpush3.bf16.msra.mxu0 %v4187_v62  ;;  %v4226_v8 = vpack.c.bf16 %v886_v6, %v879_v5  ;;  %v1842_v40 = vmul.f32 %v4989_v16, %v4989_v16  ;;  %v1843_v22 = vmul.f32 %v4992_v17, %v4992_v17  ;;  %v1315_v43 = vsel %vm241_vm1, %v3585_v23, 0  ;;  %v235_v4 = vld [vmem:[%s5539_s2] sm:$0xff]  ;;  %v3590_v5 = vld [vmem:[%s5539_s2 + $0x18] sm:$0xff] }
  0x5e   : > { %4224 = vmatpush3.bf16.msra.mxu1 %v4223_v63  ;;  %4189 = vmatprep.subr.bf16.mxu0 %v4679_v3  ;;  %v1318_v28 = vand.u32 4294901760, %v1303_v25  ;;  %v4208_v31 = vpack.c.bf16 %v348_v45, %v341_v37  ;;  %v4244_v32 = vpack.c.bf16 %v884_v57, %v877_v56  ;;  %v1321_v33 = vand.u32 4294901760, %v1304_v34 }
  0x5f   : > { %4225 = vmatprep.subr.bf16.mxu1 %v4679_v3  ;;  %3803 = vmatprep.mubr.msk.f32.mxu0 %vm4680_vm0, %v4681_v13  ;;  %v1857_v36 = vand.u32 4294901760, %v1842_v40  ;;  %v1860_v41 = vand.u32 4294901760, %v1843_v22  ;;  %v1854_v44 = vsel %vm241_vm1, %v3589_v24, 0  ;;  %v1324_v20 = vand.u32 4294901760, %v4979_v14 }
  0x60   : > { %3869 = vmatprep.mubr.msk.f32.mxu1 %vm4680_vm0, %v4681_v13  ;;  %v5044_v19 = vsub.f32 %v1303_v25, %v1318_v28  ;;  %v5047_v30 = vsub.f32 %v1304_v34, %v1321_v33  ;;  %v1327_v37 = vand.u32 4294901760, %v4984_v15  ;;  %v5050_v42 = vand.u32 4294901760, %v1315_v43  ;;  %v3594_v34 = vld [vmem:[%s5539_s2 + $0x20] sm:$0xff] }
  0x61   : > { %4191 = vmatpush3.bf16.msra.mxu0 %v4190_v7  ;;  %v5052_v45 = vand.u32 4294901760, %v1854_v44  ;;  %v1863_v48 = vand.u32 4294901760, %v4989_v16  ;;  %v1866_v49 = vand.u32 4294901760, %v4992_v17  ;;  %v5063_v50 = vsub.f32 %v4979_v14, %v1324_v20 }
  0x62   : > { %4227 = vmatpush3.bf16.msra.mxu1 %v4226_v8  ;;  %4192 = vmatprep.subr.bf16.mxu0 %v4679_v3  ;;  %v1399_v51 = vand.u32 4294901760, %v5044_v19  ;;  %v5069_v52 = vsub.f32 %v4984_v15, %v1327_v37  ;;  %v5072_v53 = vsub.f32 %v1315_v43, %v5050_v42  ;;  %v4682_v2 = vmov 0   ;;  %v3598_v43 = vld [vmem:[%s5539_s2 + $0x28] sm:$0xff] }
  0x63   : > { %4228 = vmatprep.subr.bf16.mxu1 %v4679_v3  ;;  %v5081_v56 = vsub.f32 %v4989_v16, %v1863_v48  ;;  %v5084_v57 = vsub.f32 %v4992_v17, %v1866_v49  ;;  %v1413_v61 = vand.u32 4294901760, %v5063_v50  ;;  %4528 = vset.pattern.permute.xlu0 %v4682_v2  ;;  %vm730_vm2 = vcmask 1043456  }
  0x64   : > { %3804 = vmatmul.mubr.f32.vlgmr.msra.gmra.mrb[0].mxu0 %v4899_v38  ;;  %v1400_v60 = vsub.f32 %v5044_v19, %v1399_v51  ;;  %v1388_v62 = vand.u32 4294901760, %v5072_v53  ;;  %v1420_v1 = vand.u32 4294901760, %v5069_v52  ;;  %4529 = vset.pattern.permute.xlu1 %v4682_v2  ;;  %v5216_v2 = vld [vmem:[%s4840_s11 + $0x58] sm:$0xff]  ;;  %vm3449_vm3 = vcmask 1040384  }
  0x65   : > { %3870 = vmatmul.mubr.f32.vlgmr.msra.gmra.mrb[0].mxu1 %v4901_v39  ;;  %4194 = vmatpush3.bf16.msra.mxu0 %v4193_v9  ;;  %v1952_v8 = vand.u32 4294901760, %v5081_v56  ;;  %v1959_v9 = vand.u32 4294901760, %v5084_v57  ;;  %vm3451_vm4 = vcmask 1041408  }
  0x66   : > { %4230 = vmatpush3.bf16.msra.mxu1 %v4229_v10  ;;  %4195 = vmatprep.subr.bf16.mxu0 %v4679_v3  ;;  %v5126_v10 = vpack.c.bf16 %v1327_v37, %v1324_v20  ;;  %v1421_v16 = vsub.f32 %v5069_v52, %v1420_v1  ;;  %v4268_v37 = vpack.c.bf16 %v5069_v52, %v5063_v50 }
  0x67   : > { %4231 = vmatprep.subr.bf16.mxu1 %v4679_v3  ;;  %3814 = vmatprep.mubr.msk.f32.mxu0 %vm4680_vm0, %v4681_v13  ;;  %v1960_v25 = vsub.f32 %v5084_v57, %v1959_v9 }
  0x68   : > { %3880 = vmatprep.mubr.msk.f32.mxu1 %vm4680_vm0, %v4681_v13  ;;  %238 = vperm.xlu0 %4528, %v235_v4  }
  0x69   : > { %4197 = vmatpush3.bf16.msra.mxu0 %v4196_v11  ;;  %v1414_v11 = vsub.f32 %v5063_v50, %v1413_v61  ;;  %1850 = vperm.xlu1 %4529, %v3590_v5  }
  0x6a   : > { %4233 = vmatpush3.bf16.msra.mxu1 %v4232_v12  ;;  %4198 = vmatprep.subr.bf16.mxu0 %v4679_v3  ;;  %v1389_v12 = vsub.f32 %v5072_v53, %v1388_v62 }
  0x6b   : > { %4234 = vmatprep.subr.bf16.mxu1 %v4679_v3  ;;  %v1415_v23 = vand.u32 4294901760, %v1414_v11 }
  0x6c   : > { %3815 = vmatmul.mubr.f32.vlgmr.msra.gmra.mrb[0].mxu0 %v4920_v46  ;;  %v5054_v46 = vsub.f32 %v1842_v40, %v1857_v36 }
  0x6d   : > { %3881 = vmatmul.mubr.f32.vlgmr.msra.gmra.mrb[0].mxu1 %v4923_v47  ;;  %4200 = vmatpush3.bf16.msra.mxu0 %v4866_v21  ;;  %v5056_v47 = vsub.f32 %v1843_v22, %v1860_v41 }
  0x6e   : > { %4236 = vmatpush3.bf16.msra.mxu1 %v4880_v27  ;;  %4201 = vmatprep.subr.bf16.mxu0 %v4679_v3  ;;  %v1938_v58 = vand.u32 4294901760, %v5054_v46 }
  0x6f   : > { %4237 = vmatprep.subr.bf16.mxu1 %v4679_v3  ;;  %3825 = vmatprep.mubr.msk.f32.mxu0 %vm4680_vm0, %v4681_v13  ;;  %v1945_v59 = vand.u32 4294901760, %v5056_v47  ;;  %v4301_v20 = vpack.c.bf16 %v5056_v47, %v5054_v46 }
  0x70   : > { %3891 = vmatprep.mubr.msk.f32.mxu1 %vm4680_vm0, %v4681_v13  ;;  %v1939_v6 = vsub.f32 %v5054_v46, %v1938_v58  ;;  %2385 = vperm.xlu1 %4529, %v3594_v34   ;;  %v3597_v46 = vld [vmem:[%s5538_s1 + $0x28] sm:$0xff] }
  0x71   : > { %4203 = vmatpush3.bf16.msra.mxu0 %v4860_v18  ;;  %v1946_v7 = vsub.f32 %v5056_v47, %v1945_v59 }
  0x72   : > { %4239 = vmatpush3.bf16.msra.mxu1 %v4884_v29  ;;  %4204 = vmatprep.subr.bf16.mxu0 %v4679_v3 }
  0x73   : > { %4240 = vmatprep.subr.bf16.mxu1 %v4679_v3  ;;  %v1947_v17 = vand.u32 4294901760, %v1946_v7  ;;  %v4313_v7 = vpack.c.bf16 %v1945_v59, %v1938_v58 }
  0x74   : > { %3826 = vmatmul.mubr.f32.vlgmr.msra.gmra.mrb[0].mxu0 %v316_v54  ;;  %v5075_v54 = vsub.f32 %v1854_v44, %v5052_v45  ;;  %2921 = vperm.xlu1 %4529, %v3598_v43   ;;  %v4265_v44 = vpack.c.bf16 %v5047_v30, %v5044_v19  ;;  %v2914_v19 = vmul.f32 %v5216_v2, %v5216_v2 }
  0x75   : > { %3892 = vmatmul.mubr.f32.vlgmr.msra.gmra.mrb[0].mxu1 %v852_v55  ;;  %4206 = vmatpush3.bf16.msra.mxu0 %v4205_v26  ;;  %v1406_v55 = vand.u32 4294901760, %v5047_v30  ;;  %v3582_v26 = vld [vmem:[%s5539_s2 + $0x8] sm:$0xff] }
  0x76   : > { %4242 = vmatpush3.bf16.msra.mxu1 %v4241_v35  ;;  %4207 = vmatprep.subr.bf16.mxu0 %v4679_v3  ;;  %v1927_v63 = vand.u32 4294901760, %v5075_v54  ;;  %v1390_v35 = vand.u32 4294901760, %v1389_v12  ;;  %v2931_v11 = vand.u32 4294901760, %v2914_v19 }
  0x77   : > { %4243 = vmatprep.subr.bf16.mxu1 %v4679_v3  ;;  %3836 = vmatprep.mubr.msk.f32.mxu0 %vm4680_vm0, %v4681_v13  ;;  %v1407_v0 = vsub.f32 %v5047_v30, %v1406_v55  ;;  %v4277_v5 = vpack.c.bf16 %v1406_v55, %v1399_v51  ;;  %v3593_v30 = vld [vmem:[%s5538_s1 + $0x20] sm:$0xff]  ;;  %v4280_v51 = vpack.c.bf16 %v1420_v1, %v1413_v61 }
  0x78   : > { %3902 = vmatprep.mubr.msk.f32.mxu1 %vm4680_vm0, %v4681_v13  ;;  %v1928_v14 = vsub.f32 %v5075_v54, %v1927_v63  ;;  %775 = vperm.xlu0 %4528, %v3582_v26   ;;  %v4316_v55 = vpack.c.bf16 %v1959_v9, %v1952_v8  ;;  %v5280_v1 = vsub.f32 %v2914_v19, %v2931_v11  ;;  %v2937_v9 = vand.u32 4294901760, %v5216_v2 }
  0x79   : > { %4209 = vmatpush3.bf16.msra.mxu0 %v4208_v31  ;;  %v1408_v15 = vand.u32 4294901760, %v1407_v0  ;;  %v5213_v0 = vld [vmem:[%s4840_s11 + $0x50] sm:$0xff] }
  0x7a   : > { %4245 = vmatpush3.bf16.msra.mxu1 %v4244_v32  ;;  %4210 = vmatprep.subr.bf16.mxu0 %v4679_v3  ;;  %v1929_v40 = vand.u32 4294901760, %v1928_v14  ;;  %v1961_v32 = vand.u32 4294901760, %v1960_v25  ;;  %v5308_v25 = vsub.f32 %v5216_v2, %v2937_v9  ;;  %v3016_v34 = vand.u32 4294901760, %v5280_v1 }
  0x7b   : > { %4246 = vmatprep.subr.bf16.mxu1 %v4679_v3 }
  0x7c   : > { %3837 = vmatmul.mubr.f32.vlgmr.msra.gmra.mrb[0].mxu0 %v4899_v38 }
  0x7d   : > { %3903 = vmatmul.mubr.f32.vlgmr.msra.gmra.mrb[0].mxu1 %v4901_v39  ;;  %4212 = vmatpush3.bf16.msra.mxu0 %v4866_v21  ;;  %v5094_v21 = vpack.c.bf16 %v1321_v33, %v1318_v28  ;;  %v1422_v28 = vand.u32 4294901760, %v1421_v16 }
  0x7e   : > { %4248 = vmatpush3.bf16.msra.mxu1 %v4880_v27  ;;  %4213 = vmatprep.subr.bf16.mxu0 %v4679_v3  ;;  %v5096_v27 = vpack.c.bf16 %v1860_v41, %v1857_v36  ;;  %v3586_v41 = vld [vmem:[%s5539_s2 + $0x10] sm:$0xff] }
  0x7f   : > { %4249 = vmatprep.subr.bf16.mxu1 %v4679_v3  ;;  %3847 = vmatprep.mubr.msk.f32.mxu0 %vm4680_vm0, %v4681_v13  ;;  %v4262_v33 = vpack.c.bf16 %v1422_v28, %v1415_v23 }
  0x80   : > { %3913 = vmatprep.mubr.msk.f32.mxu1 %vm4680_vm0, %v4681_v13  ;;  %1311 = vperm.xlu0 %4528, %v3586_v41  }
  0x81   : > { %4215 = vmatpush3.bf16.msra.mxu0 %v4860_v18  ;;  %v5128_v18 = vpack.c.bf16 %v1866_v49, %v1863_v48  ;;  %v4304_v48 = vpack.c.bf16 %v5084_v57, %v5081_v56  ;;  %v5203_v49 = vld [vmem:[%s4840_s11 + $0x40] sm:$0xff] }
  0x82   : > { %4251 = vmatpush3.bf16.msra.mxu1 %v4884_v29  ;;  %4252 = vmatprep.subr.bf16.mxu0 %v4679_v3  ;;  %v1401_v29 = vand.u32 4294901760, %v1400_v60  ;;  %v5208_v60 = vld [vmem:[%s4840_s11 + $0x48] sm:$0xff]  ;;  %v2377_v4 = vmul.f32 %v5203_v49, %v5203_v49  ;;  %v2398_v52 = vand.u32 4294901760, %v5203_v49  ;;  %s4609_s11 = scalar_lea.vmem %s4608_s25, 64 }
  0x83   : > { %4288 = vmatprep.subr.bf16.mxu1 %v4679_v3  ;;  %v2401_v57 = vand.u32 4294901760, %v5208_v60  ;;  %p4611_p1 = scmp.lt.s32.totalorder %s4609_s11, %s4603_s20 }
  0x84   : > { %3848 = vmatmul.mubr.f32.vlgmr.msra.gmra.mrb[0].mxu0 %v4899_v38  ;;  %v1940_v38 = vand.u32 4294901760, %v1939_v6  ;;  %v4259_v22 = vpack.c.bf16 %v1408_v15, %v1401_v29  ;;  %v2378_v6 = vmul.f32 %v5208_v60, %v5208_v60  ;;  %v2913_v29 = vmul.f32 %v5213_v0, %v5213_v0 }
  0x85   : > { %3914 = vmatmul.mubr.f32.vlgmr.msra.gmra.mrb[0].mxu1 %v4901_v39  ;;  %4254 = vmatpush3.bf16.msra.mxu0 %v5094_v21  ;;  %v1953_v39 = vsub.f32 %v5081_v56, %v1952_v8  ;;  %v2392_v47 = vand.u32 4294901760, %v2377_v4  ;;  %v2934_v8 = vand.u32 4294901760, %v5213_v0  ;;  %v5287_v12 = vsub.f32 %v5203_v49, %v2398_v52  ;;  %p4612_p4 = por %p4611_p1, %p4610_p10 }
  0x86   : > { %4290 = vmatpush3.bf16.msra.mxu1 %v5096_v27  ;;  %4255 = vmatprep.subr.bf16.mxu0 %v4679_v3  ;;  %v4295_v24 = vpack.c.bf16 %v1947_v17, %v1940_v38  ;;  %v2395_v58 = vand.u32 4294901760, %v2378_v6  ;;  %v2928_v59 = vand.u32 4294901760, %v2913_v29  ;;  %v5293_v15 = vsub.f32 %v5208_v60, %v2401_v57 }
  0x87   : > { %4291 = vmatprep.subr.bf16.mxu1 %v4679_v3  ;;  %3924 = vmatprep.mubr.msk.f32.mxu0 %vm4680_vm0, %v4681_v13  ;;  %v1954_v31 = vand.u32 4294901760, %v1953_v39  ;;  %v5268_v50 = vsub.f32 %v2377_v4, %v2392_v47  ;;  %v5305_v39 = vsub.f32 %v5213_v0, %v2934_v8  ;;  %v5344_v41 = vpack.c.bf16 %v2401_v57, %v2398_v52  ;;  %p4613_p11 = pnand %p4612_p4, %p4606_p9 }
  0x88   : > { %3990 = vmatprep.mubr.msk.f32.mxu1 %vm4680_vm0, %v4681_v13  ;;  %v5271_v56 = vsub.f32 %v2378_v6, %v2395_v58  ;;  %v2494_v28 = vand.u32 4294901760, %v5293_v15 }
  0x89   : > { %4257 = vmatpush3.bf16.msra.mxu0 %v5126_v10  ;;  %v4298_v36 = vpack.c.bf16 %v1961_v32, %v1954_v31  ;;  %v2473_v14 = vand.u32 4294901760, %v5268_v50  ;;  %v3017_v32 = vsub.f32 %v5280_v1, %v3016_v34 }
  0x8a   : > { %4293 = vmatpush3.bf16.msra.mxu1 %v5128_v18  ;;  %4258 = vmatprep.subr.bf16.mxu0 %v4679_v3  ;;  %v2480_v17 = vand.u32 4294901760, %v5271_v56 }
  0x8b   : > { %4294 = vmatprep.subr.bf16.mxu1 %v4679_v3  ;;  %v3018_v49 = vand.u32 4294901760, %v3017_v32 }
  0x8c   : > { %3925 = vmatmul.mubr.f32.vlgmr.msra.gmra.mrb[2].mxu0 %v1390_v35  ;;  %v2474_v35 = vsub.f32 %v5268_v50, %v2473_v14 }
  0x8d   : > { %3991 = vmatmul.mubr.f32.vlgmr.msra.gmra.mrb[2].mxu1 %v1929_v40  ;;  %4260 = vmatpush3.bf16.msra.mxu0 %v4259_v22  ;;  %v2487_v40 = vand.u32 4294901760, %v5287_v12 }
  0x8e   : > { %4296 = vmatpush3.bf16.msra.mxu1 %v4295_v24  ;;  %4261 = vmatprep.subr.bf16.mxu0 %v4679_v3  ;;  %v2481_v24 = vsub.f32 %v5271_v56, %v2480_v17 }
  0x8f   : > { %4297 = vmatprep.subr.bf16.mxu1 %v4679_v3  ;;  %3935 = vmatprep.mubr.msk.f32.mxu0 %vm4680_vm0, %v4681_v13  ;;  %v2488_v43 = vsub.f32 %v5287_v12, %v2487_v40 }
  0x90   : > { %4001 = vmatprep.mubr.msk.f32.mxu1 %vm4680_vm0, %v4681_v13 }
  0x91   : > { %4263 = vmatpush3.bf16.msra.mxu0 %v4262_v33  ;;  %v3023_v33 = vand.u32 4294901760, %v5305_v39 }
  0x92   : > { %4299 = vmatpush3.bf16.msra.mxu1 %v4298_v36  ;;  %4264 = vmatprep.subr.bf16.mxu0 %v4679_v3  ;;  %v3030_v36 = vand.u32 4294901760, %v5308_v25 }
  0x93   : > { %4300 = vmatprep.subr.bf16.mxu1 %v4679_v3 }
  0x94   : > { %3936 = vmatmul.mubr.f32.vlgmr.msra.gmra.mrb[2].mxu0 %v5050_v42  ;;  %v3031_v60 = vsub.f32 %v5308_v25, %v3030_v36 }
  0x95   : > { %4002 = vmatmul.mubr.f32.vlgmr.msra.gmra.mrb[2].mxu1 %v5052_v45  ;;  %4266 = vmatpush3.bf16.msra.mxu0 %v4265_v44 }
  0x96   : > { %4302 = vmatpush3.bf16.msra.mxu1 %v4301_v20  ;;  %4267 = vmatprep.subr.bf16.mxu0 %v4679_v3  ;;  %v3032_v19 = vand.u32 4294901760, %v3031_v60 }
  0x97   : > { %4303 = vmatprep.subr.bf16.mxu1 %v4679_v3  ;;  %3946 = vmatprep.mubr.msk.f32.mxu0 %vm4680_vm0, %v4681_v13 }
  0x98   : > { %4012 = vmatprep.mubr.msk.f32.mxu1 %vm4680_vm0, %v4681_v13 }
  0x99   : > { %4269 = vmatpush3.bf16.msra.mxu0 %v4268_v37  ;;  %v2482_v37 = vand.u32 4294901760, %v2481_v24 }
  0x9a   : > { %4305 = vmatpush3.bf16.msra.mxu1 %v4304_v48  ;;  %4270 = vmatprep.subr.bf16.mxu0 %v4679_v3  ;;  %v2495_v48 = vsub.f32 %v5293_v15, %v2494_v28 }
  0x9b   : > { %4306 = vmatprep.subr.bf16.mxu1 %v4679_v3 }
  0x9c   : > { %3947 = vmatmul.mubr.f32.vlgmr.msra.gmra.mrb[2].mxu0 %v5072_v53  ;;  %v2389_v53 = vsel %vm241_vm1, %v3593_v30, 0 }
  0x9d   : > { %4013 = vmatmul.mubr.f32.vlgmr.msra.gmra.mrb[2].mxu1 %v5075_v54  ;;  %4272 = vmatpush3.bf16.msra.mxu0 %v5094_v21  ;;  %v2925_v54 = vsel %vm241_vm1, %v3597_v46, 0  ;;  %v5274_v61 = vand.u32 4294901760, %v2389_v53 }
  0x9e   : > { %4308 = vmatpush3.bf16.msra.mxu1 %v5096_v27  ;;  %4273 = vmatprep.subr.bf16.mxu0 %v4679_v3 }
  0x9f   : > { %4309 = vmatprep.subr.bf16.mxu1 %v4679_v3  ;;  %3957 = vmatprep.mubr.msk.f32.mxu0 %vm4680_vm0, %v4681_v13  ;;  %v5296_v16 = vsub.f32 %v2389_v53, %v5274_v61  ;;  %v4352_v53 = vpack.c.bf16 %v2494_v28, %v2487_v40 }
  0xa0   : > { %4023 = vmatprep.mubr.msk.f32.mxu1 %vm4680_vm0, %v4681_v13 }
  0xa1   : > { %4275 = vmatpush3.bf16.msra.mxu0 %v5126_v10  ;;  %v2462_v22 = vand.u32 4294901760, %v5296_v16 }
  0xa2   : > { %4311 = vmatpush3.bf16.msra.mxu1 %v5128_v18  ;;  %4276 = vmatprep.subr.bf16.mxu0 %v4679_v3 }
  0xa3   : > { %4312 = vmatprep.subr.bf16.mxu1 %v4679_v3  ;;  %v2463_v44 = vsub.f32 %v5296_v16, %v2462_v22 }
  0xa4   : > { %3958 = vmatmul.mubr.f32.vlgmr.msra.gmra.mrb[2].mxu0 %v1388_v62  ;;  %v5276_v62 = vand.u32 4294901760, %v2925_v54 }
  0xa5   : > { %4024 = vmatmul.mubr.f32.vlgmr.msra.gmra.mrb[2].mxu1 %v1927_v63  ;;  %4278 = vmatpush3.bf16.msra.mxu0 %v4277_v5  ;;  %v5278_v63 = vsub.f32 %v2913_v29, %v2928_v59  ;;  %v2464_v0 = vand.u32 4294901760, %v2463_v44  ;;  %v2489_v5 = vand.u32 4294901760, %v2488_v43 }
  0xa6   : > { %4314 = vmatpush3.bf16.msra.mxu1 %v4313_v7  ;;  %4279 = vmatprep.subr.bf16.mxu0 %v4679_v3  ;;  %v5299_v38 = vsub.f32 %v2925_v54, %v5276_v62  ;;  %v2496_v7 = vand.u32 4294901760, %v2495_v48  ;;  %v4388_v54 = vpack.c.bf16 %v3030_v36, %v3023_v33 }
  0xa7   : > { %4315 = vmatprep.subr.bf16.mxu1 %v4679_v3  ;;  %3968 = vmatprep.mubr.msk.f32.mxu0 %vm4680_vm0, %v4681_v13  ;;  %v3009_v26 = vand.u32 4294901760, %v5278_v63 }
  0xa8   : > { %4034 = vmatprep.mubr.msk.f32.mxu1 %vm4680_vm0, %v4681_v13  ;;  %v2998_v23 = vand.u32 4294901760, %v5299_v38  ;;  %v4334_v30 = vpack.c.bf16 %v2496_v7, %v2489_v5 }
  0xa9   : > { %4281 = vmatpush3.bf16.msra.mxu0 %v4280_v51  ;;  %v3010_v31 = vsub.f32 %v5278_v63, %v3009_v26  ;;  %v4373_v51 = vpack.c.bf16 %v5280_v1, %v5278_v63 }
  0xaa   : > { %4317 = vmatpush3.bf16.msra.mxu1 %v4316_v55  ;;  %4282 = vmatprep.subr.bf16.mxu0 %v4679_v3  ;;  %v2999_v20 = vsub.f32 %v5299_v38, %v2998_v23  ;;  %v4340_v55 = vpack.c.bf16 %v5293_v15, %v5287_v12 }
  0xab   : > { %4318 = vmatprep.subr.bf16.mxu1 %v4679_v3 }
  0xac   : > { %3969 = vmatmul.mubr.f32.vlgmr.msra.gmra.mrb[2].mxu0 %v5050_v42  ;;  %v3000_v2 = vand.u32 4294901760, %v2999_v20 }
  0xad   : > { %4035 = vmatmul.mubr.f32.vlgmr.msra.gmra.mrb[2].mxu1 %v5052_v45  ;;  %4284 = vmatpush3.bf16.msra.mxu0 %v5094_v21  ;;  %v5318_v21 = vpack.c.bf16 %v2395_v58, %v2392_v47  ;;  %v4337_v47 = vpack.c.bf16 %v5271_v56, %v5268_v50  ;;  %v4376_v58 = vpack.c.bf16 %v5308_v25, %v5305_v39 }
  0xae   : > { %4320 = vmatpush3.bf16.msra.mxu1 %v5096_v27  ;;  %4285 = vmatprep.subr.bf16.mxu0 %v4679_v3  ;;  %v5320_v27 = vpack.c.bf16 %v2931_v11, %v2928_v59  ;;  %v4349_v59 = vpack.c.bf16 %v2480_v17, %v2473_v14  ;;  %v4385_v11 = vpack.c.bf16 %v3016_v34, %v3009_v26 }
  0xaf   : > { %4321 = vmatprep.subr.bf16.mxu1 %v4679_v3  ;;  %3979 = vmatprep.mubr.msk.f32.mxu0 %vm4680_vm0, %v4681_v13 }
  0xb0   : > { %4045 = vmatprep.mubr.msk.f32.mxu1 %vm4680_vm0, %v4681_v13 }
  0xb1   : > { %4287 = vmatpush3.bf16.msra.mxu0 %v5126_v10  ;;  %v5346_v10 = vpack.c.bf16 %v2937_v9, %v2934_v8 }
  0xb2   : > { %4323 = vmatpush3.bf16.msra.mxu1 %v5128_v18  ;;  %4324 = vmatprep.subr.bf16.mxu0 %v4679_v3  ;;  %v2475_v18 = vand.u32 4294901760, %v2474_v35 }
  0xb3   : > { %4360 = vmatprep.subr.bf16.mxu1 %v4679_v3 }
  0xb4   : > { %3980 = vmatmul.mubr.f32.vlgmr.msra.gmra.mrb[2].mxu0 %v5050_v42  ;;  %v3011_v42 = vand.u32 4294901760, %v3010_v31  ;;  %v4331_v4 = vpack.c.bf16 %v2482_v37, %v2475_v18 }
  0xb5   : > { %4046 = vmatmul.mubr.f32.vlgmr.msra.gmra.mrb[2].mxu1 %v5052_v45  ;;  %4326 = vmatpush3.bf16.msra.mxu0 %v5318_v21  ;;  %v3024_v45 = vsub.f32 %v5305_v39, %v3023_v33 }
  0xb6   : > { %4362 = vmatpush3.bf16.msra.mxu1 %v5320_v27  ;;  %4327 = vmatprep.subr.bf16.mxu0 %v4679_v3  ;;  %v4367_v6 = vpack.c.bf16 %v3018_v49, %v3011_v42 }
  0xb7   : > { %4363 = vmatprep.subr.bf16.mxu1 %v4679_v3  ;;  %4056 = vmatprep.mubr.msk.f32.mxu0 %vm4680_vm0, %v4681_v13  ;;  %v3025_v29 = vand.u32 4294901760, %v3024_v45 }
  0xb8   : > { %4122 = vmatprep.mubr.msk.f32.mxu1 %vm4680_vm0, %v4681_v13 }
  0xb9   : > { %4329 = vmatpush3.bf16.msra.mxu0 %v5344_v41  ;;  %v4370_v46 = vpack.c.bf16 %v3032_v19, %v3025_v29 }
  0xba   : > { %4365 = vmatpush3.bf16.msra.mxu1 %v5346_v10  ;;  %4330 = vmatprep.subr.bf16.mxu0 %v4679_v3 }
  0xbb   : > { %4366 = vmatprep.subr.bf16.mxu1 %v4679_v3 }
  0xbc   : > { %4057 = vmatmul.mubr.f32.vlgmr.msra.gmra.mrb[4].mxu0 %v2464_v0 }
  0xbd   : > { %4123 = vmatmul.mubr.f32.vlgmr.msra.gmra.mrb[4].mxu1 %v3000_v2  ;;  %4332 = vmatpush3.bf16.msra.mxu0 %v4331_v4 }
  0xbe   : > { %4368 = vmatpush3.bf16.msra.mxu1 %v4367_v6  ;;  %4333 = vmatprep.subr.bf16.mxu0 %v4679_v3 }
  0xbf   : > { %4369 = vmatprep.subr.bf16.mxu1 %v4679_v3  ;;  %4067 = vmatprep.mubr.msk.f32.mxu0 %vm4680_vm0, %v4681_v13 }
  0xc0   : > { %4133 = vmatprep.mubr.msk.f32.mxu1 %vm4680_vm0, %v4681_v13 }
  0xc1   : > { %4335 = vmatpush3.bf16.msra.mxu0 %v4334_v30 }
  0xc2   : > { %4371 = vmatpush3.bf16.msra.mxu1 %v4370_v46  ;;  %4336 = vmatprep.subr.bf16.mxu0 %v4679_v3 }
  0xc3   : > { %4372 = vmatprep.subr.bf16.mxu1 %v4679_v3 }
  0xc4   : > { %4068 = vmatmul.mubr.f32.vlgmr.msra.gmra.mrb[4].mxu0 %v5274_v61 }
  0xc5   : > { %4134 = vmatmul.mubr.f32.vlgmr.msra.gmra.mrb[4].mxu1 %v5276_v62  ;;  %4338 = vmatpush3.bf16.msra.mxu0 %v4337_v47 }
  0xc6   : > { %4374 = vmatpush3.bf16.msra.mxu1 %v4373_v51  ;;  %4339 = vmatprep.subr.bf16.mxu0 %v4679_v3 }
  0xc7   : > { %4375 = vmatprep.subr.bf16.mxu1 %v4679_v3  ;;  %4078 = vmatprep.mubr.msk.f32.mxu0 %vm4680_vm0, %v4681_v13 }
  0xc8   : > { %4144 = vmatprep.mubr.msk.f32.mxu1 %vm4680_vm0, %v4681_v13 }
  0xc9   : > { %4341 = vmatpush3.bf16.msra.mxu0 %v4340_v55 }
  0xca   : > { %4377 = vmatpush3.bf16.msra.mxu1 %v4376_v58  ;;  %4342 = vmatprep.subr.bf16.mxu0 %v4679_v3 }
  0xcb   : > { %4378 = vmatprep.subr.bf16.mxu1 %v4679_v3 }
  0xcc   : > { %4079 = vmatmul.mubr.f32.vlgmr.msra.gmra.mrb[4].mxu0 %v5296_v16 }
  0xcd   : > { %4145 = vmatmul.mubr.f32.vlgmr.msra.gmra.mrb[4].mxu1 %v5299_v38  ;;  %4344 = vmatpush3.bf16.msra.mxu0 %v5318_v21 }
  0xce   : > { %4380 = vmatpush3.bf16.msra.mxu1 %v5320_v27  ;;  %4345 = vmatprep.subr.bf16.mxu0 %v4679_v3 }
  0xcf   : > { %4381 = vmatprep.subr.bf16.mxu1 %v4679_v3  ;;  %4155 = vmatprep.mubr.msk.f32.mxu1 %vm4680_vm0, %v4681_v13 }
  0xd0   : > { %4089 = vmatprep.mubr.msk.f32.mxu0 %vm4680_vm0, %v4681_v13 }
  0xd1   : > { %4347 = vmatpush3.bf16.msra.mxu0 %v5344_v41 }
  0xd2   : > { %4383 = vmatpush3.bf16.msra.mxu1 %v5346_v10  ;;  %4348 = vmatprep.subr.bf16.mxu0 %v4679_v3 }
  0xd3   : > { %4384 = vmatprep.subr.bf16.mxu1 %v4679_v3 }
  0xd4   : > { %4090 = vmatmul.mubr.f32.vlgmr.msra.gmra.mrb[4].mxu0 %v2462_v22 }
  0xd5   : > { %4156 = vmatmul.mubr.f32.vlgmr.msra.gmra.mrb[4].mxu1 %v2998_v23  ;;  %4350 = vmatpush3.bf16.msra.mxu0 %v4349_v59 }
  0xd6   : > { %4386 = vmatpush3.bf16.msra.mxu1 %v4385_v11  ;;  %4351 = vmatprep.subr.bf16.mxu0 %v4679_v3 }
  0xd7   : > { %4387 = vmatprep.subr.bf16.mxu1 %v4679_v3  ;;  %4100 = vmatprep.mubr.msk.f32.mxu0 %vm4680_vm0, %v4681_v13 }
  0xd8   : > { %4166 = vmatprep.mubr.msk.f32.mxu1 %vm4680_vm0, %v4681_v13 }
  0xd9   : > { %4353 = vmatpush3.bf16.msra.mxu0 %v4352_v53 }
  0xda   : > { %4389 = vmatpush3.bf16.msra.mxu1 %v4388_v54  ;;  %4354 = vmatprep.subr.bf16.mxu0 %v4679_v3 }
  0xdb   : > { %4390 = vmatprep.subr.bf16.mxu1 %v4679_v3 }
  0xdc   : > { %4101 = vmatmul.mubr.f32.vlgmr.msra.gmra.mrb[4].mxu0 %v5274_v61 }
  0xdd   : > { %4167 = vmatmul.mubr.f32.vlgmr.msra.gmra.mrb[4].mxu1 %v5276_v62  ;;  %4356 = vmatpush3.bf16.msra.mxu0 %v5318_v21 }
  0xde   : > { %4392 = vmatpush3.bf16.msra.mxu1 %v5320_v27  ;;  %4357 = vmatprep.subr.bf16.mxu0 %v4679_v3 }
  0xdf   : > { %4393 = vmatprep.subr.bf16.mxu1 %v4679_v3  ;;  %4111 = vmatprep.mubr.msk.f32.mxu0 %vm4680_vm0, %v4681_v13 }
  0xe0   : > { %4177 = vmatprep.mubr.msk.f32.mxu1 %vm4680_vm0, %v4681_v13 }
  0xe1   : > { %4359 = vmatpush3.bf16.msra.mxu0 %v5344_v41 }
  0xe2   : > { %4395 = vmatpush3.bf16.msra.mxu1 %v5346_v10 }
  0xe4   : > { %4112 = vmatmul.mubr.f32.vlgmr.msra.gmra.mrb[4].mxu0 %v5274_v61 }
  0xe5   : > { %4178 = vmatmul.mubr.f32.vlgmr.msra.gmra.mrb[4].mxu1 %v5276_v62 }
  0xe7   : > { %v239_v50 = vpop.permute.xlu0 %238 }
  0xe8   : > { %v1851_v30 = vpop.permute.xlu1 %1850 }
  0xf7   : > { %v776_v52 = vpop.permute.xlu0 %775 }
  0xff   : > { %v1312_v29 = vpop.permute.xlu0 %1311 }
 0x157   : > { %v726_v57 = vpop.f32.mrb[0].mxu0 }
 0x158   : > { %v1262_v56 = vpop.f32.mrb[0].mxu1  ;;  %v4396_v63 = vadd.f32 %v726_v57, %v239_v50  ;;  %v3849_v1 = vpop.f32.mrb[1].mxu0 }
 0x159   : > { %v4397_v3 = vadd.f32 %v1262_v56, %v776_v52  ;;  %v3915_v8 = vpop.f32.mrb[1].mxu1 }
 0x15a   : > { %v731_v13 = vsel %vm730_vm2, %v4396_v63, -inf  ;;  %v749_v31 = vrot.slane %v4396_v63, 4 }
 0x15b   : > { %v1266_v9 = vsel %vm730_vm2, %v4397_v3, -inf  ;;  %v732_v14 = vrot.slane %v731_v13, 4  ;;  %v1284_v23 = vrot.slane %v4397_v3, 4 }
 0x15c   : > { %v1267_v12 = vrot.slane %v1266_v9, 4 }
 0x15d   : > { %v733_v16 = vmax.f32 %v731_v13, %v732_v14 }
 0x15e   : > { %v1268_v15 = vmax.f32 %v1266_v9, %v1267_v12 }
 0x15f   : > { %v734_v38 = vrot.slane %v733_v16, 2 }
 0x160   : > { %v1269_v61 = vrot.slane %v1268_v15, 2 }
 0x161   : > { %v735_v17 = vmax.f32 %v733_v16, %v734_v38 }
 0x162   : > { %v1270_v62 = vmax.f32 %v1268_v15, %v1269_v61 }
 0x163   : > { %v736_v25 = vrot.slane %v735_v17, 1 }
 0x164   : > { %v1271_v39 = vrot.slane %v1270_v62, 1 }
 0x165   : > { %v737_v34 = vmax.f32 %v735_v17, %v736_v25 }
 0x166   : > { %v1272_v26 = vmax.f32 %v1270_v62, %v1271_v39 }
 0x167   : > { %v738_v27 = vsub.f32 %v4396_v63, %v737_v34 }
 0x168   : > { %v1273_v21 = vsub.f32 %v4397_v3, %v1272_v26 }
 0x169   : > { %v739_v40 = vmul.f32 1.442695, %v738_v27 }
 0x16a   : > { %v1274_v35 = vmul.f32 1.442695, %v1273_v21 }
 0x16c   : > { %4530 = vpow2.f32 %v1274_v35 }
 0x16d   : > { %4532 = vpow2.f32 %v739_v40 }
 0x176   : > { %v4531_v22 = vpop.eup %4530 }
 0x177   : > { %v4533_v24 = vpop.eup %4532  ;;  %v1276_v28 = vsel %vm730_vm2, %v4531_v22, 0.0  ;;  %v1286_v33 = vmul.f32 %v4531_v22, %v1284_v23 }
 0x178   : > { %v1277_v32 = vrot.slane %v1276_v28, 4  ;;  %v741_v36 = vsel %vm730_vm2, %v4533_v24, 0.0  ;;  %v751_v10 = vmul.f32 %v4533_v24, %v749_v31 }
 0x179   : > { %v742_v41 = vrot.slane %v741_v36, 4  ;;  %v1287_v20 = vsel %vm730_vm2, %v1286_v33, 0.0 }
 0x17a   : > { %v1278_v18 = vadd.f32 %v1277_v32, %v1276_v28  ;;  %v752_v48 = vsel %vm730_vm2, %v751_v10, 0.0  ;;  %v1288_v49 = vrot.slane %v1287_v20, 4 }
 0x17b   : > { %v743_v43 = vadd.f32 %v742_v41, %v741_v36  ;;  %v753_v0 = vrot.slane %v752_v48, 4 }
 0x17c   : > { %v1279_v44 = vrot.slane %v1278_v18, 2  ;;  %v1289_v5 = vadd.f32 %v1288_v49, %v1287_v20 }
 0x17d   : > { %v744_v37 = vrot.slane %v743_v43, 2  ;;  %v754_v7 = vadd.f32 %v753_v0, %v752_v48 }
 0x17e   : > { %v1280_v42 = vadd.f32 %v1279_v44, %v1278_v18  ;;  %v1290_v19 = vrot.slane %v1289_v5, 2 }
 0x17f   : > { %v745_v45 = vadd.f32 %v744_v37, %v743_v43  ;;  %v755_v46 = vrot.slane %v754_v7, 2 }
 0x180   : > { %v1281_v60 = vrot.slane %v1280_v42, 1  ;;  %v1291_v11 = vadd.f32 %v1290_v19, %v1289_v5 }
 0x181   : > { %v746_v2 = vrot.slane %v745_v45, 1  ;;  %v756_v50 = vadd.f32 %v755_v46, %v754_v7 }
 0x182   : > { %v1282_v4 = vadd.f32 %v1281_v60, %v1280_v42  ;;  %v1292_v63 = vrot.slane %v1291_v11, 1 }
 0x183   : > { %v747_v6 = vadd.f32 %v746_v2, %v745_v45  ;;  %v757_v9 = vrot.slane %v756_v50, 1  ;;  %v2386_v45 = vpop.permute.xlu1 %2385 }
 0x184   : > { %4534 = vrcp.f32 %v1282_v4  ;;  %v1293_v38 = vadd.f32 %v1292_v63, %v1291_v11 }
 0x185   : > { %4536 = vrcp.f32 %v747_v6  ;;  %v758_v17 = vadd.f32 %v757_v9, %v756_v50 }
 0x187   : > { %v1798_v51 = vpop.f32.mrb[2].mxu0  ;;  %v2922_v2 = vpop.permute.xlu1 %2921 }
 0x188   : > { %v2337_v47 = vpop.f32.mrb[2].mxu1  ;;  %v4398_v55 = vadd.f32 %v1798_v51, %v1312_v29  ;;  %v3981_v58 = vpop.f32.mrb[3].mxu0 }
 0x189   : > { %v4047_v59 = vpop.f32.mrb[3].mxu1  ;;  %v5468_v53 = vadd.f32 %v2337_v47, %v1851_v30 }
 0x18a   : > { %v1802_v54 = vsel %vm730_vm2, %v4398_v55, -inf  ;;  %v1820_v33 = vrot.slane %v4398_v55, 4 }
 0x18b   : > { %v1803_v52 = vrot.slane %v1802_v54, 4  ;;  %v2341_v8 = vsel %vm730_vm2, %v5468_v53, -inf }
 0x18c   : > { %v2342_v16 = vrot.slane %v2341_v8, 4 }
 0x18d   : > { %v1804_v57 = vmax.f32 %v1802_v54, %v1803_v52 }
 0x18e   : > { %v4535_v56 = vpop.eup %4534  ;;  %v2343_v21 = vmax.f32 %v2341_v8, %v2342_v16 }
 0x18f   : > { %v4537_v3 = vpop.eup %4536  ;;  %v1295_v1 = vmul.f32 %v4535_v56, %v1282_v4  ;;  %v1805_v12 = vrot.slane %v1804_v57, 2 }
 0x190   : > { %v760_v13 = vmul.f32 %v4537_v3, %v747_v6  ;;  %v2344_v22 = vrot.slane %v2343_v21, 2 }
 0x191   : > { %v1296_v14 = vsub.f32 2.0, %v1295_v1  ;;  %v1806_v61 = vmax.f32 %v1804_v57, %v1805_v12 }
 0x192   : > { %v761_v15 = vsub.f32 2.0, %v760_v13  ;;  %v2345_v24 = vmax.f32 %v2343_v21, %v2344_v22 }
 0x193   : > { %v1297_v62 = vmul.f32 %v4535_v56, %v1296_v14  ;;  %v1807_v25 = vrot.slane %v1806_v61, 1 }
 0x194   : > { %v762_v39 = vmul.f32 %v4537_v3, %v761_v15  ;;  %v2346_v28 = vrot.slane %v2345_v24, 1 }
 0x195   : > { %v1298_v26 = vmul.f32 %v1297_v62, %v1293_v38  ;;  %v1808_v27 = vmax.f32 %v1806_v61, %v1807_v25 }
 0x196   : > { %v763_v34 = vmul.f32 %v762_v39, %v758_v17  ;;  %v2347_v31 = vmax.f32 %v2345_v24, %v2346_v28 }
 0x197   : > { %v1809_v40 = vsub.f32 %v4398_v55, %v1808_v27 }
 0x198   : > { %v1299_v35 = vadd.f32 %v1298_v26, %v763_v34  ;;  %v2348_v18 = vsub.f32 %v5468_v53, %v2347_v31 }
 0x199   : > { %v1810_v23 = vmul.f32 1.442695, %v1809_v40 }
 0x19a   : > { %v2349_v37 = vmul.f32 1.442695, %v2348_v18 }
 0x19b   : > { %4538 = vpow2.f32 %v1810_v23  ;;  %v2359_v23 = vrot.slane %v5468_v53, 4 }
 0x19c   : > { %4540 = vpow2.f32 %v2349_v37 }
 0x1a5   : > { %v4539_v32 = vpop.eup %4538 }
 0x1a6   : > { %v1812_v36 = vsel %vm730_vm2, %v4539_v32, 0.0  ;;  %v1822_v10 = vmul.f32 %v4539_v32, %v1820_v33  ;;  %v4541_v51 = vpop.eup %4540 }
 0x1a7   : > { %v1813_v41 = vrot.slane %v1812_v36, 4  ;;  %v2351_v52 = vsel %vm730_vm2, %v4541_v51, 0.0  ;;  %v2361_v33 = vmul.f32 %v4541_v51, %v2359_v23 }
 0x1a8   : > { %v1823_v20 = vsel %vm730_vm2, %v1822_v10, 0.0  ;;  %v2352_v13 = vrot.slane %v2351_v52, 4 }
 0x1a9   : > { %v1814_v43 = vadd.f32 %v1813_v41, %v1812_v36  ;;  %v1824_v42 = vrot.slane %v1823_v20, 4 }
 0x1aa   : > { %v2353_v17 = vadd.f32 %v2352_v13, %v2351_v52 }
 0x1ab   : > { %v1815_v44 = vrot.slane %v1814_v43, 2  ;;  %v1825_v0 = vadd.f32 %v1824_v42, %v1823_v20 }
 0x1ac   : > { %v2354_v27 = vrot.slane %v2353_v17, 2 }
 0x1ad   : > { %v1816_v48 = vadd.f32 %v1815_v44, %v1814_v43  ;;  %v1826_v4 = vrot.slane %v1825_v0, 2 }
 0x1ae   : > { %v2355_v40 = vadd.f32 %v2354_v27, %v2353_v17  ;;  %v1837_v27 = vstv %s1836_s13 }
 0x1af   : > { %v1817_v49 = vrot.slane %v1816_v48, 1  ;;  %v1827_v55 = vadd.f32 %v1826_v4, %v1825_v0 }
 0x1b0   : > { %v2356_v22 = vrot.slane %v2355_v40, 1 }
 0x1b1   : > { %v1818_v60 = vadd.f32 %v1817_v49, %v1816_v48  ;;  %v1828_v56 = vrot.slane %v1827_v55, 1  ;;  %v2362_v48 = vsel %vm730_vm2, %v2361_v33, 0.0 }
 0x1b2   : > { %v2357_v32 = vadd.f32 %v2356_v22, %v2355_v40  ;;  %v2363_v0 = vrot.slane %v2362_v48, 4  ;;  %v3447_v40 = vstv %s3599_s14 }
 0x1b3   : > { %4542 = vrcp.f32 %v1818_v60  ;;  %v1829_v12 = vadd.f32 %v1828_v56, %v1827_v55 }
 0x1b7   : > { %v2872_v5 = vpop.f32.mrb[4].mxu0 }
 0x1b8   : > { %v3408_v6 = vpop.f32.mrb[4].mxu1  ;;  %v4400_v7 = vadd.f32 %v2872_v5, %v2386_v45  ;;  %v4113_v19 = vpop.f32.mrb[5].mxu0 }
 0x1b9   : > { %v4401_v29 = vadd.f32 %v3408_v6, %v2922_v2  ;;  %v4179_v30 = vpop.f32.mrb[5].mxu1  ;;  %v2364_v19 = vadd.f32 %v2363_v0, %v2362_v48 }
 0x1ba   : > { %v2876_v46 = vsel %vm730_vm2, %v4400_v7, -inf  ;;  %v2894_v28 = vrot.slane %v4400_v7, 4 }
 0x1bb   : > { %v3412_v47 = vsel %vm730_vm2, %v4401_v29, -inf  ;;  %v2877_v58 = vrot.slane %v2876_v46, 4  ;;  %v3430_v18 = vrot.slane %v4401_v29, 4  ;;  %v2365_v55 = vrot.slane %v2364_v19, 2 }
 0x1bc   : > { %v3413_v59 = vrot.slane %v3412_v47, 4 }
 0x1bd   : > { %v2878_v11 = vmax.f32 %v2876_v46, %v2877_v58  ;;  %v4543_v50 = vpop.eup %4542 }
 0x1be   : > { %v3414_v54 = vmax.f32 %v3412_v47, %v3413_v59  ;;  %v1831_v57 = vmul.f32 %v4543_v50, %v1818_v60 }
 0x1bf   : > { %v2879_v3 = vrot.slane %v2878_v11, 2 }
 0x1c0   : > { %v3415_v63 = vrot.slane %v3414_v54, 2  ;;  %v1832_v1 = vsub.f32 2.0, %v1831_v57 }
 0x1c1   : > { %v2880_v8 = vmax.f32 %v2878_v11, %v2879_v3 }
 0x1c2   : > { %v3416_v9 = vmax.f32 %v3414_v54, %v3415_v63  ;;  %v1833_v14 = vmul.f32 %v4543_v50, %v1832_v1  ;;  %v2366_v54 = vadd.f32 %v2365_v55, %v2364_v19 }
 0x1c3   : > { %v2881_v15 = vrot.slane %v2880_v8, 1 }
 0x1c4   : > { %v3417_v16 = vrot.slane %v3416_v9, 1  ;;  %v1834_v61 = vmul.f32 %v1833_v14, %v1829_v12  ;;  %v2367_v63 = vrot.slane %v2366_v54, 1 }
 0x1c5   : > { %v2882_v38 = vmax.f32 %v2880_v8, %v2881_v15 }
 0x1c6   : > { %v3418_v62 = vmax.f32 %v3416_v9, %v3417_v16  ;;  %v5479_v39 = vadd.f32 %v1834_v61, %v1299_v35  ;;  %v2368_v16 = vadd.f32 %v2367_v63, %v2366_v54 }
 0x1c7   : > { %v2883_v25 = vsub.f32 %v4400_v7, %v2882_v38 }
 0x1c8   : > { %v3419_v26 = vsub.f32 %v4401_v29, %v3418_v62  ;;  %v1838_v23 = vadd.f32 %v1837_v27, %v5479_v39 }
 0x1c9   : > { %v2884_v34 = vmul.f32 1.442695, %v2883_v25 }
 0x1ca   : > { %v3420_v21 = vmul.f32 1.442695, %v3419_v26 }
 0x1cb   : > { %4544 = vpow2.f32 %v2884_v34 }
 0x1cc   : > { %4546 = vpow2.f32 %v3420_v21 }
 0x1cd   : > { %4548 = vrcp.f32 %v2357_v32 }
 0x1d5   : > { %v4545_v24 = vpop.eup %4544 }
 0x1d6   : > { %v4547_v31 = vpop.eup %4546  ;;  %v2886_v36 = vsel %vm730_vm2, %v4545_v24, 0.0  ;;  %v2896_v41 = vmul.f32 %v4545_v24, %v2894_v28 }
 0x1d7   : > { %v2887_v35 = vrot.slane %v2886_v36, 4  ;;  %v3422_v10 = vsel %vm730_vm2, %v4547_v31, 0.0  ;;  %v3432_v20 = vmul.f32 %v4547_v31, %v3430_v18  ;;  %v4549_v51 = vpop.eup %4548 }
 0x1d8   : > { %v3423_v43 = vrot.slane %v3422_v10, 4  ;;  %v2897_v42 = vsel %vm730_vm2, %v2896_v41, 0.0  ;;  %v2370_v59 = vmul.f32 %v4549_v51, %v2357_v32 }
 0x1d9   : > { %v2888_v44 = vadd.f32 %v2887_v35, %v2886_v36  ;;  %v3433_v60 = vsel %vm730_vm2, %v3432_v20, 0.0  ;;  %v2898_v2 = vrot.slane %v2897_v42, 4 }
 0x1da   : > { %v3424_v37 = vadd.f32 %v3423_v43, %v3422_v10  ;;  %v3434_v7 = vrot.slane %v3433_v60, 4  ;;  %v2371_v52 = vsub.f32 2.0, %v2370_v59 }
 0x1db   : > { %v2889_v53 = vrot.slane %v2888_v44, 2  ;;  %v2899_v30 = vadd.f32 %v2898_v2, %v2897_v42 }
 0x1dc   : > { %v3425_v49 = vrot.slane %v3424_v37, 2  ;;  %v3435_v47 = vadd.f32 %v3434_v7, %v3433_v60  ;;  %v2372_v13 = vmul.f32 %v4549_v51, %v2371_v52 }
 0x1dd   : > { %v2890_v45 = vadd.f32 %v2889_v53, %v2888_v44  ;;  %v2900_v58 = vrot.slane %v2899_v30, 2 }
 0x1de   : > { %v3426_v4 = vadd.f32 %v3425_v49, %v3424_v37  ;;  %v3436_v11 = vrot.slane %v3435_v47, 2  ;;  %v2373_v17 = vmul.f32 %v2372_v13, %v2368_v16 }
 0x1df   : > { %v2891_v5 = vrot.slane %v2890_v45, 1  ;;  %v2901_v50 = vadd.f32 %v2900_v58, %v2899_v30 }
 0x1e0   : > { %v3427_v6 = vrot.slane %v3426_v4, 1  ;;  %v3437_v56 = vadd.f32 %v3436_v11, %v3435_v47 }
 0x1e1   : > { %v2892_v29 = vadd.f32 %v2891_v5, %v2890_v45  ;;  %v2902_v1 = vrot.slane %v2901_v50, 1 }
 0x1e2   : > { %v3428_v46 = vadd.f32 %v3427_v6, %v3426_v4  ;;  %v3438_v14 = vrot.slane %v3437_v56, 1 }
 0x1e3   : > { %4550 = vrcp.f32 %v2892_v29  ;;  %v2903_v61 = vadd.f32 %v2902_v1, %v2901_v50 }
 0x1e4   : > { %4552 = vrcp.f32 %v3428_v46  ;;  %v3439_v26 = vadd.f32 %v3438_v14, %v3437_v56 }
 0x1ed   : > { %v4551_v57 = vpop.eup %4550 }
 0x1ee   : > { %v4553_v3 = vpop.eup %4552  ;;  %v2905_v8 = vmul.f32 %v4551_v57, %v2892_v29 }
 0x1ef   : > { %v3441_v9 = vmul.f32 %v4553_v3, %v3428_v46 }
 0x1f0   : > { %v2906_v12 = vsub.f32 2.0, %v2905_v8 }
 0x1f1   : > { %v3442_v15 = vsub.f32 2.0, %v3441_v9 }
 0x1f2   : > { %v2907_v38 = vmul.f32 %v4551_v57, %v2906_v12 }
 0x1f3   : > { %v3443_v62 = vmul.f32 %v4553_v3, %v3442_v15 }
 0x1f4   : > { %v2908_v25 = vmul.f32 %v2907_v38, %v2903_v61 }
 0x1f5   : > { %v3444_v21 = vmul.f32 %v3443_v62, %v3439_v26 }
 0x1f6   : > { %v2909_v34 = vadd.f32 %v2908_v25, %v2373_v17 }
 0x1f8   : > { %v3445_v22 = vadd.f32 %v3444_v21, %v2909_v34 }
 0x1fa   : > { %v3448_v24 = vadd.f32 %v3447_v40, %v3445_v22 }
 0x1fc   : > { %v3450_v28 = vsel %vm3449_vm3, %v1838_v23, %v3448_v24 }
 0x1fd   : > { %v3452_v31 = vsel %vm3451_vm4, %v3450_v28, -inf }
 0x1fe   : > { %v3453_v32 = vrot.slane %v3452_v31, 4 }
 0x200   : > { %v3454_v33 = vmax.f32 %v3452_v31, %v3453_v32 }
 0x202   : > { %v3455_v36 = vrot.slane %v3454_v33, 2 }
 0x204   : > { %v3456_v35 = vmax.f32 %v3454_v33, %v3455_v36 }
 0x206   : > { %v3457_v41 = vrot.slane %v3456_v35, 1 }
 0x208   : > { %v3458_v10 = vmax.f32 %v3456_v35, %v3457_v41 }
 0x20a   : > { %v3459_v18 = vsub.f32 %v3450_v28, %v3458_v10 }
 0x20c   : > { %v3460_v43 = vmul.f32 1.442695, %v3459_v18 }
 0x20e   : > { %4554 = vpow2.f32 %v3460_v43 }
 0x218   : > { %v4555_v44 = vpop.eup %4554 }
 0x219   : > { %v3462_v20 = vsel %vm3451_vm4, %v4555_v44, 0.0 }
 0x21a   : > { %v3463_v37 = vrot.slane %v3462_v20, 4 }
 0x21c   : > { %v3464_v48 = vadd.f32 %v3463_v37, %v3462_v20 }
 0x21e   : > { %v3465_v39 = vrot.slane %v3464_v48, 2 }
 0x220   : > { %v3466_v53 = vadd.f32 %v3465_v39, %v3464_v48 }
 0x222   : > { %v3467_v42 = vrot.slane %v3466_v53, 1 }
 0x224   : > { %v3468_v49 = vadd.f32 %v3467_v42, %v3466_v53 }
 0x226   : > { %4556 = vrcp.f32 %v3468_v49 }
 0x230   : > { %v4557_v45 = vpop.eup %4556 }
 0x231   : > { %v3470_v60 = vmul.f32 %v4557_v45, %v3468_v49 }
 0x233   : > { %v3471_v0 = vsub.f32 2.0, %v3470_v60 }
 0x235   : > { %v3472_v2 = vmul.f32 %v4557_v45, %v3471_v0 }
 0x237   : > { %v3473_v4 = vmul.f32 %v4555_v44, %v3472_v2 }
 0x239   : > { %3474 = vst [vmem:[%s229_s5] sm:$0x3] %v3473_v4 }
 0x23a   : > { %4616 = shalt.err (!%p4613_p11)
}
 0x23b   : > { %s4617_s6 = scalar_lea.hbm %s5493_s29, 32  ;;  %s4621_s8 = scalar_lea.hbm %s5541_s4, 64 }
 0x23c   : > { %p4618_p0 = scmp.ne.s32.totalorder %s5493_s29, %s4617_s6  ;;  %p4622_p6 = scmp.lt.u32.totalorder %s5493_s29, %s5541_s4 }
 0x23d   : > { %p4623_p3 = scmp.lt.u32.totalorder %s4621_s8, %s4617_s6  ;;  %p4625_p5 = scmp.lt.u32.totalorder %s4617_s6, %s5493_s29 }
 0x23e   : > { %p4619_p2 = pnand %p4618_p0, %p5555_p12 }
 0x23f   : > { %p4624_p13 = por %p4623_p3, %p4622_p6 }
 0x240   : > { %p4620_p7 = pneg %p4619_p2 }
 0x241   : > { %p4626_p8 = por %p4625_p5, %p4624_p13 }
 0x243   : > { %p4627_p9 = pnand %p4626_p8, %p4620_p7 }
 0x245   : > { %4630 = shalt.err (!%p4627_p9)
}
 0x246   : > { %4471 = dma.vmem_to_hbm [thread:$0]  (%p5555_p12), %s5495_s7, 32, %s5493_s29, %s3476_s9  }
 0x247 PF: > { %s3501_s22 = sand.u32 1, %s4661_s15   ;;  %p5556_p10 = scmp.ne.s32.totalorder %s5548_s28, 0 }
 0x248   : > { %p5557_p1 = scmp.ge.s32.totalorder %s4673_s18, 2  ;;  %s3502_s23 = scalar_lea.sflag [#allocation4], %s3501_s22 }
 0x24a   : > { %p4482_p4 = pnand %p5557_p1, %p5556_p10 }
 0x24c   : > { %4656 = dma.done.wait (!%p4482_p4), %s3502_s23, 32  }
 0x24d   : > { %4658 = vsyncadd (!%p4482_p4), %s3502_s23, 4294967264  ;;  %p18_p11 = scmp.ge.s32.totalorder %s4734_s21, 4   ;;  %s5558_s15 = smov %s4665_s16 }
 0x24e   : > { %s5559_s16 = smov %s4669_s17  ;;  %s5560_s17 = smov %s4746_s24 }
 0x24f   : > { %s5561_s18 = smov %s4734_s21  ;;  %20 = sbr.rel (!%p18_p11) target bundleno = 6 (0x6), region = 101 }
 0x256   :  { %3507 = vsyncpa [#allocation3], 1 }
 0x257   :  { %3509 = vsyncpa [#allocation3 + $0x1], 1 }
 0x258   :  { %3510 = vsyncpa [#allocation4], 1 }
 0x259   :  { %3512 = vsyncpa [#allocation4 + $0x1], 1 }
 0x25a   :  { %3513 = vsyncpa [#allocation5], 1 }
 0x25b   :  { %3515 = vsyncpa [#allocation5 + $0x1], 1 }

</bundles_post_ra>
